<compile_context>
chip_gen: v7x
topology: tpu7x:2x2x1
jax: 0.10.0
libtpu: 0.0.40
codegen_flags: <defaults>
</compile_context>

<pallas_src>
import functools

import jax
import jax.numpy as jnp
from jax.experimental import pallas as pl
from jax.experimental.pallas import tpu as pltpu


def _vq_kernel(h_ref, et_ref, e_ref, esq_ref, q_ref, idx_ref, ssq_ref, *,
               b_valid):
    """One tile of TB flattened tokens per grid step.

    h_ref:   (TB, Dp)  f32 tokens (zero-padded rows / columns)
    et_ref:  (Dp, K)   f32 codebook, transposed
    e_ref:   (K, Dp)   f32 codebook
    esq_ref: (1, K)    f32 per-code squared norms
    q_ref:   (TB, Dp)  quantized tokens (out)
    idx_ref: (TB, 1)   int32 argmin indices (out)
    ssq_ref: (1, 1)    f32 running sum of (q - h)^2 over valid rows (out, acc)
    """
    tb = h_ref.shape[0]
    k = e_ref.shape[0]

    h = h_ref[...]  # (TB, Dp) f32

    # Codebook scores.  ||h||^2 is constant per row, so argmin only needs
    # ||e_k||^2 - 2 * h . e_k.  Single MXU contraction for all codes.
    dots = jnp.dot(h, et_ref[...], preferred_element_type=jnp.float32)  # (TB, K)
    dist = esq_ref[...] - 2.0 * dots                                    # (TB, K)

    # First-occurrence argmin along the lane (K) axis.
    min_d = jnp.min(dist, axis=1, keepdims=True)                        # (TB, 1)
    iota_k = jax.lax.broadcasted_iota(jnp.int32, (tb, k), 1)
    idx = jnp.min(jnp.where(dist <= min_d, iota_k, k), axis=1,
                  keepdims=True)                                        # (TB, 1)
    idx_ref[...] = idx.astype(jnp.int32)

    # Embedding gather as a one-hot matmul on the MXU.
    onehot = (iota_k == idx).astype(jnp.float32)                        # (TB, K)
    q = jnp.dot(onehot, e_ref[...], preferred_element_type=jnp.float32)  # (TB, Dp)
    q_ref[...] = q.astype(q_ref.dtype)

    # Masked partial sum of squared error (padded rows excluded; padded
    # columns are zero in both q and h so they contribute nothing).
    row = pl.program_id(0) * tb + jax.lax.broadcasted_iota(
        jnp.int32, (tb, 1), 0)
    valid = (row < b_valid).astype(jnp.float32)                         # (TB, 1)
    diff = (q - h) * valid
    per_row = jnp.sum(diff * diff, axis=1, keepdims=True)               # (TB, 1)
    total = jnp.sum(per_row, axis=0, keepdims=True)                     # (1, 1)

    @pl.when(pl.program_id(0) == 0)
    def _():
        ssq_ref[...] = jnp.zeros_like(ssq_ref)

    ssq_ref[...] += total


def chameleon_vq_quantize(hidden_nchw, embedding, *, beta=0.25, tb=256):
    """Forward pass of ChameleonVQVAEVectorQuantizer.

    hidden_nchw: (N, D, H, W)   activations
    embedding:   (K, D)         codebook (nn.Embedding.weight)
    Returns: (quant_nchw (N, D, H, W), loss scalar, indices (N*H*W,) int32)
    """
    N, D, H, W = hidden_nchw.shape
    K, D2 = embedding.shape
    assert D2 == D, (D2, D)

    # permute(0,2,3,1) + view(-1, D)  -- module glue.
    h_flat = jnp.transpose(hidden_nchw, (0, 2, 3, 1)).reshape(-1, D)
    h_flat = h_flat.astype(jnp.float32)
    emb = embedding.astype(jnp.float32)
    B = h_flat.shape[0]

    # Lane-dense channel padding (exact) and token-tile padding.
    Dp = ((D + 127) // 128) * 128
    tb = max(8, (tb // 8) * 8)
    B_pad = ((B + tb - 1) // tb) * tb
    nb = B_pad // tb

    h_p = jnp.pad(h_flat, ((0, B_pad - B), (0, Dp - D)))   # (B_pad, Dp)
    e_p = jnp.pad(emb, ((0, 0), (0, Dp - D)))              # (K, Dp)
    e_t = e_p.T                                            # (Dp, K)
    e_sq = jnp.sum(e_p * e_p, axis=1)[None, :]             # (1, K)

    q_pad, idx_pad, ssq = pl.pallas_call(
        functools.partial(_vq_kernel, b_valid=B),
        out_shape=(
            jax.ShapeDtypeStruct((B_pad, Dp), hidden_nchw.dtype),
            jax.ShapeDtypeStruct((B_pad, 1), jnp.int32),
            jax.ShapeDtypeStruct((1, 1), jnp.float32),
        ),
        grid_spec=pltpu.PrefetchScalarGridSpec(
            num_scalar_prefetch=0,
            grid=(nb,),
            in_specs=[
                pl.BlockSpec((tb, Dp), lambda i: (i, 0)),   # tokens
                pl.BlockSpec((Dp, K), lambda i: (0, 0)),    # codebook^T
                pl.BlockSpec((K, Dp), lambda i: (0, 0)),    # codebook
                pl.BlockSpec((1, K), lambda i: (0, 0)),     # ||e||^2
            ],
            out_specs=[
                pl.BlockSpec((tb, Dp), lambda i: (i, 0)),   # quantized tokens
                pl.BlockSpec((tb, 1), lambda i: (i, 0)),    # indices
                pl.BlockSpec((1, 1), lambda i: (0, 0)),     # loss accumulator
            ],
        ),
        compiler_params=pltpu.CompilerParams(
            # The loss accumulator revisits its block every step -> the grid
            # axis is a reduction axis for that output.
            dimension_semantics=("arbitrary",),
            vmem_limit_bytes=64 * 1024 * 1024,
        ),
    )(h_p, e_t, e_p, e_sq)

    # Module glue: strip padding, reshape, permute back to NCHW.
    q = q_pad[:B, :D].reshape(N, H, W, D)
    quant_nchw = jnp.transpose(q, (0, 3, 1, 2))
    indices = idx_pad[:B, 0]

    # loss = mean((q.detach()-h)^2) + beta*mean((q-h.detach())^2)
    #      = (1+beta) * mean((q-h)^2)   (value-wise)
    loss = (1.0 + beta) * ssq[0, 0] / jnp.float32(B * D)
    return quant_nchw, loss, indices


def _reference(hidden_nchw, embedding, beta=0.25):
    N, D, H, W = hidden_nchw.shape
    h = jnp.transpose(hidden_nchw, (0, 2, 3, 1)).reshape(-1, D)
    h = h.astype(jnp.float32)
    e = embedding.astype(jnp.float32)
    dist = (jnp.sum(h * h, axis=1, keepdims=True) + jnp.sum(e * e, axis=1)
            - 2.0 * h @ e.T)
    idx = jnp.argmin(dist, axis=1)
    q = e[idx].reshape(N, H, W, D)
    hh = h.reshape(N, H, W, D)
    loss = jnp.mean((q - hh) ** 2) + beta * jnp.mean((q - hh) ** 2)
    quant = jnp.transpose(q, (0, 3, 1, 2))
    return quant, loss, idx.astype(jnp.int32)


if __name__ == "__main__":
    key = jax.random.PRNGKey(0)
    k_x, k_e = jax.random.split(key, 2)

    # Small shapes consistent with the module: N=2, embed_dim=32, 16x16
    # spatial grid, 128-entry codebook.
    N, D, H, W, K = 2, 32, 16, 16, 128
    beta = 0.25
    x = jax.random.normal(k_x, (N, D, H, W), dtype=jnp.float32)
    emb = jax.random.normal(k_e, (K, D), dtype=jnp.float32)

    quant, loss, idx = chameleon_vq_quantize(x, emb, beta=beta)
    quant = jax.block_until_ready(quant)
    loss = jax.block_until_ready(loss)
    idx = jax.block_until_ready(idx)

    ref_q, ref_loss, ref_idx = _reference(x, emb, beta=beta)

    assert quant.shape == ref_q.shape, (quant.shape, ref_q.shape)
    assert idx.shape == ref_idx.shape, (idx.shape, ref_idx.shape)
    assert jnp.array_equal(idx, ref_idx), "index mismatch"
    assert jnp.allclose(quant, ref_q, atol=1e-5, rtol=1e-5), float(
        jnp.max(jnp.abs(quant - ref_q)))
    assert jnp.allclose(loss, ref_loss, atol=1e-5, rtol=1e-5), (
        float(loss), float(ref_loss))

    print("KERNEL_OK")
</pallas_src>

<mosaic_0001>
module attributes {stable_mosaic.version = 11 : i64} {
  func.func @_vq_kernel(%arg0: i32, %arg1: memref<256x128xf32, #tpu.memory_space<vmem>>, %arg2: memref<128x128xf32, #tpu.memory_space<vmem>>, %arg3: memref<128x128xf32, #tpu.memory_space<vmem>>, %arg4: memref<1x128xf32, #tpu.memory_space<vmem>>, %arg5: memref<256x128xf32, #tpu.memory_space<vmem>>, %arg6: memref<256x1xi32, #tpu.memory_space<vmem>>, %arg7: memref<1x1xf32, #tpu.memory_space<vmem>>) attributes {dimension_semantics = [#tpu.dimension_semantics<arbitrary>], iteration_bounds = array<i64: 2>, scalar_prefetch = 0 : i64, scratch_operands = 0 : i64, tpu.core_type = #tpu.core_type<tc>, window_params = [{transform_indices = @transform_0, window_bounds = array<i64: 256, 128>}, {pipeline_mode = #tpu.pipeline_mode<synchronous>, transform_indices = @transform_1, window_bounds = array<i64: 128, 128>}, {pipeline_mode = #tpu.pipeline_mode<synchronous>, transform_indices = @transform_2, window_bounds = array<i64: 128, 128>}, {pipeline_mode = #tpu.pipeline_mode<synchronous>, transform_indices = @transform_3, window_bounds = array<i64: 1, 128>}, {transform_indices = @transform_4, window_bounds = array<i64: 256, 128>}, {transform_indices = @transform_5, window_bounds = array<i64: 256, 1>}, {pipeline_mode = #tpu.pipeline_mode<synchronous>, transform_indices = @transform_6, window_bounds = array<i64: 1, 1>}]} {
    %c0 = arith.constant 0 : index
    %c0_0 = arith.constant 0 : index
    %0 = vector.load %arg1[%c0, %c0_0] : memref<256x128xf32, #tpu.memory_space<vmem>>, vector<256x128xf32>
    %c0_1 = arith.constant 0 : index
    %c0_2 = arith.constant 0 : index
    %1 = vector.load %arg2[%c0_1, %c0_2] : memref<128x128xf32, #tpu.memory_space<vmem>>, vector<128x128xf32>
    %cst = arith.constant dense<0.000000e+00> : vector<256x128xf32>
    %2 = tpu.matmul %0, %1, %cst {dimension_numbers = #tpu.dot_dimension_numbers<[1], [0], [0], [1], [0, 0, 1, 1], [], []>} : vector<256x128xf32>, vector<128x128xf32>, vector<256x128xf32> -> vector<256x128xf32>
    %c0_3 = arith.constant 0 : index
    %c0_4 = arith.constant 0 : index
    %3 = vector.load %arg4[%c0_3, %c0_4] : memref<1x128xf32, #tpu.memory_space<vmem>>, vector<1x128xf32>
    %cst_5 = arith.constant 2.000000e+00 : f32
    %4 = vector.broadcast %cst_5 : f32 to vector<256x128xf32>
    %5 = arith.mulf %4, %2 : vector<256x128xf32>
    %6 = vector.broadcast %3 : vector<1x128xf32> to vector<256x128xf32>
    %7 = arith.subf %6, %5 : vector<256x128xf32>
    %cst_6 = arith.constant dense<0x7F800000> : vector<256xf32>
    %8 = vector.multi_reduction <minimumf>, %7, %cst_6 [1] : vector<256x128xf32> to vector<256xf32>
    %9 = vector.shape_cast %8 : vector<256xf32> to vector<256x1xf32>
    %10 = tpu.iota {dimensions = array<i32: 1>} : vector<256x128xi32>
    %11 = vector.broadcast %9 : vector<256x1xf32> to vector<256x128xf32>
    %12 = arith.cmpf ole, %7, %11 : vector<256x128xf32>
    %c128_i32 = arith.constant 128 : i32
    %13 = vector.broadcast %c128_i32 : i32 to vector<256x128xi32>
    %14 = arith.select %12, %10, %13 : vector<256x128xi1>, vector<256x128xi32>
    %cst_7 = arith.constant dense<2147483647> : vector<256xi32>
    %15 = vector.multi_reduction <minsi>, %14, %cst_7 [1] : vector<256x128xi32> to vector<256xi32>
    %16 = vector.shape_cast %15 : vector<256xi32> to vector<256x1xi32>
    %c0_8 = arith.constant 0 : index
    %c0_9 = arith.constant 0 : index
    %17 = vector.load %arg6[%c0_8, %c0_9] : memref<256x1xi32, #tpu.memory_space<vmem>>, vector<256x1xi32>
    tpu.vector_store %arg6[%c0_8, %c0_9], %16 {strides = array<i32>} : memref<256x1xi32, #tpu.memory_space<vmem>>, vector<256x1xi32>,
    %18 = vector.broadcast %16 : vector<256x1xi32> to vector<256x128xi32>
    %19 = arith.cmpi eq, %10, %18 : vector<256x128xi32>
    %20 = arith.extui %19 : vector<256x128xi1> to vector<256x128xi32>
    %21 = arith.sitofp %20 : vector<256x128xi32> to vector<256x128xf32>
    %c0_10 = arith.constant 0 : index
    %c0_11 = arith.constant 0 : index
    %22 = vector.load %arg3[%c0_10, %c0_11] : memref<128x128xf32, #tpu.memory_space<vmem>>, vector<128x128xf32>
    %cst_12 = arith.constant dense<0.000000e+00> : vector<256x128xf32>
    %23 = tpu.matmul %21, %22, %cst_12 {dimension_numbers = #tpu.dot_dimension_numbers<[1], [0], [0], [1], [0, 0, 1, 1], [], []>} : vector<256x128xf32>, vector<128x128xf32>, vector<256x128xf32> -> vector<256x128xf32>
    %c0_13 = arith.constant 0 : index
    %c0_14 = arith.constant 0 : index
    %24 = vector.load %arg5[%c0_13, %c0_14] : memref<256x128xf32, #tpu.memory_space<vmem>>, vector<256x128xf32>
    tpu.vector_store %arg5[%c0_13, %c0_14], %23 {strides = array<i32>} : memref<256x128xf32, #tpu.memory_space<vmem>>, vector<256x128xf32>,
    %c256_i32 = arith.constant 256 : i32
    %25 = arith.muli %arg0, %c256_i32 : i32
    %26 = tpu.iota {dimensions = array<i32: 0>} : vector<256x1xi32>
    %27 = vector.broadcast %25 : i32 to vector<256x1xi32>
    %28 = arith.addi %27, %26 : vector<256x1xi32>
    %c512_i32 = arith.constant 512 : i32
    %29 = vector.broadcast %c512_i32 : i32 to vector<256x1xi32>
    %30 = arith.cmpi slt, %28, %29 : vector<256x1xi32>
    %31 = arith.extui %30 : vector<256x1xi1> to vector<256x1xi32>
    %32 = arith.sitofp %31 : vector<256x1xi32> to vector<256x1xf32>
    %33 = arith.subf %23, %0 : vector<256x128xf32>
    %34 = vector.broadcast %32 : vector<256x1xf32> to vector<256x128xf32>
    %35 = arith.mulf %33, %34 : vector<256x128xf32>
    %36 = arith.mulf %35, %35 : vector<256x128xf32>
    %cst_15 = arith.constant dense<0.000000e+00> : vector<256xf32>
    %37 = vector.multi_reduction <add>, %36, %cst_15 [1] : vector<256x128xf32> to vector<256xf32>
    %38 = vector.shape_cast %37 : vector<256xf32> to vector<256x1xf32>
    %cst_16 = arith.constant dense<0.000000e+00> : vector<1xf32>
    %39 = vector.multi_reduction <add>, %38, %cst_16 [0] : vector<256x1xf32> to vector<1xf32>
    %40 = vector.shape_cast %39 : vector<1xf32> to vector<1x1xf32>
    %c0_i32 = arith.constant 0 : i32
    %41 = arith.cmpi eq, %arg0, %c0_i32 : i32
    %42 = arith.extui %41 : i1 to i32
    %c0_i32_17 = arith.constant 0 : i32
    %43 = arith.cmpi ne, %42, %c0_i32_17 : i32
    scf.if %43 {
      %cst_22 = arith.constant 0.000000e+00 : f32
      %47 = vector.broadcast %cst_22 : f32 to vector<1x1xf32>
      %c0_23 = arith.constant 0 : index
      %c0_24 = arith.constant 0 : index
      %48 = vector.load %arg7[%c0_23, %c0_24] : memref<1x1xf32, #tpu.memory_space<vmem>>, vector<1x1xf32>
      tpu.vector_store %arg7[%c0_23, %c0_24], %47 {strides = array<i32>} : memref<1x1xf32, #tpu.memory_space<vmem>>, vector<1x1xf32>,
    } else {
    }
    %c0_18 = arith.constant 0 : index
    %c0_19 = arith.constant 0 : index
    %44 = vector.load %arg7[%c0_18, %c0_19] : memref<1x1xf32, #tpu.memory_space<vmem>>, vector<1x1xf32>
    %45 = arith.addf %44, %40 : vector<1x1xf32>
    %c0_20 = arith.constant 0 : index
    %c0_21 = arith.constant 0 : index
    %46 = vector.load %arg7[%c0_20, %c0_21] : memref<1x1xf32, #tpu.memory_space<vmem>>, vector<1x1xf32>
    tpu.vector_store %arg7[%c0_20, %c0_21], %45 {strides = array<i32>} : memref<1x1xf32, #tpu.memory_space<vmem>>, vector<1x1xf32>,
    return
  }
  func.func @transform_0(%arg0: i32) -> (i32, i32) {
    %c0_i32 = arith.constant 0 : i32
    %c0_i32_0 = arith.constant 0 : i32
    return %arg0, %c0_i32 : i32, i32
  }
  func.func @transform_1(%arg0: i32) -> (i32, i32) {
    %c0_i32 = arith.constant 0 : i32
    %c0_i32_0 = arith.constant 0 : i32
    %c0_i32_1 = arith.constant 0 : i32
    return %c0_i32, %c0_i32_0 : i32, i32
  }
  func.func @transform_2(%arg0: i32) -> (i32, i32) {
    %c0_i32 = arith.constant 0 : i32
    %c0_i32_0 = arith.constant 0 : i32
    %c0_i32_1 = arith.constant 0 : i32
    return %c0_i32, %c0_i32_0 : i32, i32
  }
  func.func @transform_3(%arg0: i32) -> (i32, i32) {
    %c0_i32 = arith.constant 0 : i32
    %c0_i32_0 = arith.constant 0 : i32
    %c0_i32_1 = arith.constant 0 : i32
    return %c0_i32, %c0_i32_0 : i32, i32
  }
  func.func @transform_4(%arg0: i32) -> (i32, i32) {
    %c0_i32 = arith.constant 0 : i32
    %c0_i32_0 = arith.constant 0 : i32
    return %arg0, %c0_i32 : i32, i32
  }
  func.func @transform_5(%arg0: i32) -> (i32, i32) {
    %c0_i32 = arith.constant 0 : i32
    %c0_i32_0 = arith.constant 0 : i32
    return %arg0, %c0_i32 : i32, i32
  }
  func.func @transform_6(%arg0: i32) -> (i32, i32) {
    %c0_i32 = arith.constant 0 : i32
    %c0_i32_0 = arith.constant 0 : i32
    %c0_i32_1 = arith.constant 0 : i32
    return %c0_i32, %c0_i32_0 : i32, i32
  }
}

</mosaic_0001>

<bundles_post_ra>
// kernel: tpu_custom_call.1
= control target key start
LH: loop header
LB: loop body
LE: loop exit
PB: predicated region body
PF: predicated region fallthrough
CT: control target
= control target key end

     0   :  { %12 = vsyncpa [#allocation3], 0  ;;  %s4360_s0 = inlined_call_operand.hbm [shape: f32[512,128], index: 0, kind: input, shape index: {}]   ;;  %s4361_s1 = inlined_call_operand.hbm [shape: f32[128,128], index: 1, kind: input, shape index: {}]   ;;  %s4362_s2 = inlined_call_operand.hbm [shape: f32[128,128], index: 2, kind: input, shape index: {}]   ;;  %s4363_s3 = inlined_call_operand.hbm [shape: f32[1,128], index: 3, kind: input, shape index: {}]   ;;  %s4364_s4 = inlined_call_operand.hbm [shape: f32[512,128], index: 4, kind: output, shape index: {0}]   ;;  %s4365_s5 = inlined_call_operand.hbm [shape: s32[512,1], index: 5, kind: output, shape index: {1}]   ;;  %s4366_s6 = inlined_call_operand.hbm [shape: f32[1,1], index: 6, kind: output, shape index: {2}]  }
   0x1   :  { %14 = vsyncpa [#allocation3 + $0x1], 0 }
   0x2   :  { %15 = vsyncpa [#allocation6], 0 }
   0x3   :  { %16 = vsyncpa [#allocation9], 0 }
   0x4   :  { %17 = vsyncpa [#allocation4], 0 }
   0x5   :  { %19 = vsyncpa [#allocation4 + $0x1], 0 }
   0x6   :  { %20 = vsyncpa [#allocation12], 0 }
   0x7   :  { %22 = vsyncpa [#allocation12 + $0x1], 0  ;;  %s3084_s21 = smov 0   ;;  %s3086_s22 = smov 0  }
   0x8   :  { %s3088_s23 = smov 0   ;;  %s3090_s24 = smov 0  }
   0x9 LB: > { %s3105_s25 = sadd.s32 4294967295, %s3033_s24   ;;  %s4368_s26 = sadd.s32 4294967294, %s3033_s24   ;;  %s3033_s24 = sphi %s3090_s24, %s4450_s24   ;;  %s3029_s23 = sphi %s3088_s23, %s4449_s23   ;;  %s3025_s22 = sphi %s3086_s22, %s4448_s22   ;;  %s3021_s21 = sphi %s3084_s21, %s4447_s21  }
   0xa   : > { %p48_p0 = scmp.ne.s32.totalorder %s3025_s22, %s3021_s21  ;;  %p4367_p1 = scmp.eq.s32.totalorder %s3105_s25, 0 }
   0xb   : > { %p141_p3 = scmp.eq.s32.totalorder %s4368_s26, 1  ;;  %p2208_p5 = scmp.ge.s32.totalorder %s3033_s24, 1 }
   0xc   : > { %p3116_p4 = por %p4367_p1, %p48_p0  ;;  %p195_p7 = scmp.lt.s32.totalorder %s3033_s24, 3 }
   0xd   : > { %p3121_p6 = por %p141_p3, %p48_p0  ;;  %s3035_s30 = smov [#allocation5]  }
   0xe   : > { %s4390_s27 = scalar_select %p3116_p4, 1, 0 }
   0xf   : > { %s4391_s28 = scalar_select %p3121_p6, 1, 0 }
  0x10   : > { %p3127_p9 = pnand %p2208_p5, %p195_p7  ;;  %s207_s7 = sshll.u32 %s3035_s30, 4  ;;  %s3131_s7 = int_to_ptr.vmem [resolvable:$true] %s207_s7 }
  0x11   : > { %s3036_s9 = smov [#allocation7]   ;;  %s3037_s11 = smov [#allocation8]  }
  0x12   : > { %s4392_s29 = scalar_select %p3127_p9, 1, 0 }
  0x13   : > { %p2677_p10 = pneg %p3127_p9  ;;  %s220_s10 = sshll.u32 %s3036_s9, 4  ;;  %s3142_s10 = int_to_ptr.vmem [resolvable:$true] %s220_s10 }
  0x14   : > { %s3144_s12 = sshll.u32 %s3037_s11, 4  ;;  %s2783_s15 = scalar_lea.hbm %s4361_s1, 2048  ;;  %s235_s12 = int_to_ptr.vmem [resolvable:$true] %s3144_s12 }
  0x15   : > { %p3138_p12 = pnand %p2677_p10, %p4367_p1  ;;  %p2784_p13 = scmp.ne.s32.totalorder %s4361_s1, %s2783_s15 }
  0x16   : > { %p2790_p7 = scmp.lt.u32.totalorder %s2783_s15, %s4361_s1 }
  0x17   : > { %p3154_p0 = pneg %p3138_p12 }
  0x19   : > { %p2786_p3 = pnand %p3154_p0, %p2784_p13 }
  0x1b   : > { %p2787_p5 = pneg %p2786_p3 }
  0x1d   : > { %p2792_p10 = pnand %p2790_p7, %p2787_p5 }
  0x1f   : > { %2795 = shalt.err (!%p2792_p10)
}
  0x20   : > { %s2796_s30 = scalar_lea.vmem %s3131_s7, 2048  ;;  %p2804_p2 = scmp.lt.s32.totalorder %s3131_s7, %s3131_s7 }
  0x21   : > { %p2797_p11 = scmp.ne.s32.totalorder %s3131_s7, %s2796_s30  ;;  %p2805_p6 = scmp.lt.s32.totalorder %s2796_s30, %s2796_s30 }
  0x23   : > { %p2799_p8 = pnand %p2797_p11, %p3154_p0  ;;  %p2806_p13 = por %p2805_p6, %p2804_p2 }
  0x25   : > { %p2800_p1 = pneg %p2799_p8 }
  0x27   : > { %p2807_p3 = pnand %p2806_p13, %p2800_p1 }
  0x29   : > { %2810 = shalt.err (!%p2807_p3)
}
  0x2a   : > { %s3038_s9 = smov 128   ;;  %s3039_s11 = smov 8  }
  0x2b   : > { %2680 = dma.hbm_to_vmem [thread:$0]  (!%p3138_p12), %s4361_s1, 2048, %s3131_s7, [#allocation6], %s3038_s9, %s3038_s9, %s3039_s11  }
  0x2c   : > { %s2811_s17 = scalar_lea.hbm %s4362_s2, 2048 }
  0x2d   : > { %p2812_p1 = scmp.ne.s32.totalorder %s4362_s2, %s2811_s17  ;;  %p2818_p8 = scmp.lt.u32.totalorder %s2811_s17, %s4362_s2 }
  0x2f   : > { %p2814_p2 = pnand %p2812_p1, %p3154_p0 }
  0x31   : > { %p2815_p6 = pneg %p2814_p2 }
  0x33   : > { %p2820_p11 = pnand %p2818_p8, %p2815_p6 }
  0x35   : > { %2823 = shalt.err (!%p2820_p11)
}
  0x36   : > { %s2824_s7 = scalar_lea.vmem %s3142_s10, 2048  ;;  %p2832_p13 = scmp.lt.s32.totalorder %s3142_s10, %s3142_s10 }
  0x37   : > { %p2825_p5 = scmp.ne.s32.totalorder %s3142_s10, %s2824_s7  ;;  %p2833_p3 = scmp.lt.s32.totalorder %s2824_s7, %s2824_s7 }
  0x39   : > { %p2827_p7 = pnand %p2825_p5, %p3154_p0  ;;  %p2834_p1 = por %p2833_p3, %p2832_p13 }
  0x3b   : > { %p2828_p10 = pneg %p2827_p7 }
  0x3d   : > { %p2835_p2 = pnand %p2834_p1, %p2828_p10 }
  0x3f   : > { %2838 = shalt.err (!%p2835_p2)
}
  0x40   : > { %2683 = dma.hbm_to_vmem [thread:$0]  (!%p3138_p12), %s4362_s2, 2048, %s3142_s10, [#allocation6], %s3038_s9, %s3038_s9, %s3039_s11  }
  0x41   : > { %s2839_s16 = scalar_lea.hbm %s4363_s3, 16 }
  0x42   : > { %p2840_p6 = scmp.ne.s32.totalorder %s4363_s3, %s2839_s16  ;;  %p2846_p5 = scmp.lt.u32.totalorder %s2839_s16, %s4363_s3 }
  0x44   : > { %p2842_p8 = pnand %p2840_p6, %p3154_p0 }
  0x46   : > { %p2843_p11 = pneg %p2842_p8 }
  0x48   : > { %p2848_p7 = pnand %p2846_p5, %p2843_p11 }
  0x4a   : > { %2851 = shalt.err (!%p2848_p7)
}
  0x4b   : > { %s2852_s7 = scalar_lea.vmem %s235_s12, 16  ;;  %s2859_s10 = scalar_lea.vmem %s235_s12, 32 }
  0x4c   : > { %p2853_p10 = scmp.ne.s32.totalorder %s235_s12, %s2852_s7  ;;  %p2860_p1 = scmp.lt.s32.totalorder %s235_s12, %s235_s12 }
  0x4d   : > { %p2861_p2 = scmp.lt.s32.totalorder %s2859_s10, %s2852_s7 }
  0x4e   : > { %p2855_p13 = pnand %p2853_p10, %p3154_p0 }
  0x4f   : > { %p2862_p4 = por %p2861_p2, %p2860_p1 }
  0x50   : > { %p2856_p3 = pneg %p2855_p13 }
  0x52   : > { %p2863_p9 = pnand %p2862_p4, %p2856_p3 }
  0x54   : > { %2866 = shalt.err (!%p2863_p9)
}
  0x55   : > { %2686 = dma.hbm_to_vmem [thread:$0]  (!%p3138_p12), %s4363_s3, 16, %s235_s12, [#allocation9]  }
  0x56   : > { %s3224_s18 = sadd.s32 1, %s3033_s24   ;;  %s35_s8 = sadd.s32 1, %s3029_s23 }
  0x57   : > { %s32_s14 = ssub.s32 %s3033_s24, %s3224_s18  ;;  %p42_p9 = scmp.ne.s32.totalorder %s3029_s23, %s3025_s22 }
  0x58   : > { %p33_p4 = scmp.eq.s32.totalorder %s32_s14, 0  ;;  %p43_p0 = scmp.eq.s32.totalorder %s3033_s24, 0 }
  0x59   : > { %p2701_p6 = scmp.lt.s32.totalorder %s3033_s24, 2  ;;  %p4395_p11 = scmp.eq.s32.totalorder %s3105_s25, 1 }
  0x5a   : > { %s3234_s15 = scalar_select %p33_p4, %s3029_s23, %s35_s8  }
  0x5b   : > { %p44_p8 = por %p43_p0, %p42_p9  ;;  %p3238_p5 = por %p4395_p11, %p42_p9 }
  0x5c   : > { %s245_s17 = sand.u32 1, %s3029_s23   ;;  %s2332_s19 = sshll.u32 %s3033_s24, 12 }
  0x5d   : > { %s2213_s12 = sshll.u32 %s245_s17, 8  ;;  %s3247_s7 = scalar_lea.hbm %s4360_s0, %s2332_s19 }
  0x5e   : > { %s249_s10 = scalar_lea.vmem [#allocation2], %s2213_s12  ;;  %p3249_p12 = pnand %p2701_p6, %p44_p8 }
  0x5f   : > { %s256_s26 = sshll.u32 %s249_s10, 4  ;;  %s3255_s14 = scalar_lea.sflag [#allocation3], %s245_s17  ;;  %s3253_s26 = int_to_ptr.vmem [resolvable:$true] %s256_s26 }
  0x60   : > { %s2867_s8 = scalar_lea.hbm %s3247_s7, 4096  ;;  %p2869_p10 = pneg %p3249_p12 }
  0x61   : > { %p2868_p7 = scmp.ne.s32.totalorder %s3247_s7, %s2867_s8  ;;  %s2872_s20 = scalar_lea.hbm %s4360_s0, 8192 }
  0x62   : > { %p2873_p1 = scmp.lt.u32.totalorder %s3247_s7, %s4360_s0  ;;  %p2874_p2 = scmp.lt.u32.totalorder %s2872_s20, %s2867_s8 }
  0x63   : > { %p2870_p13 = pnand %p2869_p10, %p2868_p7  ;;  %p2876_p9 = scmp.lt.u32.totalorder %s2867_s8, %s3247_s7 }
  0x64   : > { %p2875_p4 = por %p2874_p2, %p2873_p1 }
  0x65   : > { %p2871_p3 = pneg %p2870_p13 }
  0x66   : > { %p2877_p0 = por %p2876_p9, %p2875_p4 }
  0x68   : > { %p2878_p6 = pnand %p2877_p0, %p2871_p3 }
  0x6a   : > { %2881 = shalt.err (!%p2878_p6)
}
  0x6b   : > { %s2882_s17 = scalar_lea.vmem %s3253_s26, 4096  ;;  %s3040_s19 = smov [#allocation2]  }
  0x6c   : > { %p2883_p8 = scmp.ne.s32.totalorder %s3253_s26, %s2882_s17  ;;  %s2887_s12 = sshll.u32 %s3040_s19, 4  ;;  %s2888_s12 = int_to_ptr.vmem [resolvable:$false] %s2887_s12 }
  0x6d   : > { %s2889_s30 = scalar_lea.vmem %s2888_s12, 8192  ;;  %p2890_p13 = scmp.lt.s32.totalorder %s3253_s26, %s2888_s12 }
  0x6e   : > { %p2885_p11 = pnand %p2883_p8, %p2869_p10  ;;  %p2891_p1 = scmp.lt.s32.totalorder %s2889_s30, %s2882_s17 }
  0x70   : > { %p2886_p7 = pneg %p2885_p11  ;;  %p2892_p2 = por %p2891_p1, %p2890_p13 }
  0x72   : > { %p2893_p4 = pnand %p2892_p2, %p2886_p7 }
  0x74   : > { %2896 = shalt.err (!%p2893_p4)
}
  0x75   : > { %2690 = dma.hbm_to_vmem [thread:$0]  (!%p3249_p12), %s3247_s7, 4096, %s3253_s26, %s3255_s14, %s3038_s9, %s3038_s9, %s3039_s11  }
  0x76   : > { %p4398_p10 = scmp.ne.s32.totalorder %s4392_s29, 0 }
  0x78   : > { %268 = sbr.rel (%p4398_p10) target bundleno = 1346 (0x542), region = 36 }
  0x7f   : > { %s3289_s8 = sand.u32 1, %s3025_s22   ;;  %p4399_p3 = scmp.ne.s32.totalorder %s4390_s27, 0 }
  0x80   : > { %s3292_s20 = sshll.u32 %s3289_s8, 8  ;;  %s271_s13 = scalar_lea.sflag [#allocation3], %s3289_s8 }
  0x81   : > { %s3296_s10 = scalar_lea.vmem [#allocation2], %s3292_s20 }
  0x82   : > { %2996 = dma.done.wait (%p4399_p3), %s271_s13, 4096  }
  0x83   : > { %2998 = vsyncadd (%p4399_p3), %s271_s13, 4294963200  ;;  %p4400_p12 = scmp.eq.s32.totalorder %s3105_s25, 0 }
  0x85   : > { %3000 = dma.done.wait (%p4400_p12), [#allocation6], 4096   ;;  %p4401_p9 = pmov %p4400_p12 }
  0x87   : > { %3002 = vsyncadd (%p4401_p9), [#allocation6], 4294963200  ;;  %p4402_p0 = pmov %p4401_p9 }
  0x89   : > { %3004 = dma.done.wait (%p4402_p0), [#allocation9], 16   ;;  %p4403_p6 = pmov %p4402_p0 }
  0x8a   : > { %v355_v0 = vld [vmem:[#allocation5] sm:$0xff]  ;;  %v356_v1 = vld [vmem:[#allocation5 + $0x8] sm:$0xff]  ;;  %v357_v2 = vld [vmem:[#allocation5 + $0x10] sm:$0xff]  ;;  %s3897_s27 = scalar_lea.vmem [#allocation11], %s3292_s20  ;;  %s2288_s29 = sshll.u32 %s3105_s25, 8 }
  0x8b   : > { %3006 = vsyncadd (%p4403_p6), [#allocation9], 4294967280  ;;  %v2591_v3 = vpack.c.bf16 %v356_v1, %v355_v0  ;;  %v358_v4 = vld [vmem:[#allocation5 + $0x18] sm:$0xff]  ;;  %v359_v6 = vld [vmem:[#allocation5 + $0x20] sm:$0xff]  ;;  %s4074_s9 = scalar_lea.vmem [#allocation10], %s3292_s20  ;;  %p4439_p8 = scmp.ne.s32.totalorder %s3105_s25, 0 }
  0x8c   : > { %v2595_v5 = vpack.c.bf16 %v358_v4, %v357_v2  ;;  %v360_v7 = vld [vmem:[#allocation5 + $0x28] sm:$0xff]  ;;  %v323_v9 = vld [vmem:[%s3296_s10] sm:$0xff]  ;;  %v361_v10 = vld [vmem:[#allocation5 + $0x30] sm:$0xff] }
  0x8d   : > { %2592 = vmatprep.subr.bf16.mxu0 %v2591_v3  ;;  %v2599_v8 = vpack.c.bf16 %v360_v7, %v359_v6  ;;  %v362_v11 = vld [vmem:[#allocation5 + $0x38] sm:$0xff]  ;;  %2463 = vmatprep.mubr.f32.mxu0 %v323_v9  ;;  %v363_v13 = vld [vmem:[#allocation5 + $0x40] sm:$0xff]  ;;  %v364_v14 = vld [vmem:[#allocation5 + $0x48] sm:$0xff] }
  0x8e   : > { %2594 = vmatpush3.bf16.msra.mxu0 %v2591_v3  ;;  %v2603_v12 = vpack.c.bf16 %v362_v11, %v361_v10  ;;  %v2607_v15 = vpack.c.bf16 %v364_v14, %v363_v13  ;;  %v365_v16 = vld [vmem:[#allocation5 + $0x50] sm:$0xff]  ;;  %v366_v17 = vld [vmem:[#allocation5 + $0x58] sm:$0xff]  ;;  %v367_v19 = vld [vmem:[#allocation5 + $0x60] sm:$0xff] }
  0x8f   : > { %2596 = vmatprep.subr.bf16.mxu0 %v2595_v5  ;;  %v2611_v18 = vpack.c.bf16 %v366_v17, %v365_v16  ;;  %v368_v20 = vld [vmem:[#allocation5 + $0x68] sm:$0xff]  ;;  %v369_v22 = vld [vmem:[#allocation5 + $0x70] sm:$0xff]  ;;  %v370_v23 = vld [vmem:[#allocation5 + $0x78] sm:$0xff] }
  0x90   : > { %v2615_v21 = vpack.c.bf16 %v368_v20, %v367_v19  ;;  %v2619_v24 = vpack.c.bf16 %v370_v23, %v369_v22  ;;  %v324_v25 = vld [vmem:[%s3296_s10 + $0x8] sm:$0xff]  ;;  %v325_v26 = vld [vmem:[%s3296_s10 + $0x10] sm:$0xff]  ;;  %v326_v27 = vld [vmem:[%s3296_s10 + $0x18] sm:$0xff] }
  0x91   : > { %v327_v28 = vld [vmem:[%s3296_s10 + $0x20] sm:$0xff]  ;;  %v328_v29 = vld [vmem:[%s3296_s10 + $0x28] sm:$0xff]  ;;  %v329_v30 = vld [vmem:[%s3296_s10 + $0x30] sm:$0xff] }
  0x92   : > { %2598 = vmatpush3.bf16.msra.mxu0 %v2595_v5  ;;  %v330_v31 = vld [vmem:[%s3296_s10 + $0x38] sm:$0xff]  ;;  %v331_v32 = vld [vmem:[%s3296_s10 + $0x40] sm:$0xff]  ;;  %v332_v33 = vld [vmem:[%s3296_s10 + $0x48] sm:$0xff] }
  0x93   : > { %2600 = vmatprep.subr.bf16.mxu0 %v2599_v8  ;;  %v333_v34 = vld [vmem:[%s3296_s10 + $0x50] sm:$0xff]  ;;  %v334_v35 = vld [vmem:[%s3296_s10 + $0x58] sm:$0xff]  ;;  %v335_v36 = vld [vmem:[%s3296_s10 + $0x60] sm:$0xff] }
  0x94   : > { %v336_v37 = vld [vmem:[%s3296_s10 + $0x68] sm:$0xff]  ;;  %v337_v38 = vld [vmem:[%s3296_s10 + $0x70] sm:$0xff]  ;;  %v338_v39 = vld [vmem:[%s3296_s10 + $0x78] sm:$0xff] }
  0x95   : > { %v339_v40 = vld [vmem:[%s3296_s10 + $0x80] sm:$0xff]  ;;  %v340_v41 = vld [vmem:[%s3296_s10 + $0x88] sm:$0xff]  ;;  %v341_v42 = vld [vmem:[%s3296_s10 + $0x90] sm:$0xff] }
  0x96   : > { %2602 = vmatpush3.bf16.msra.mxu0 %v2599_v8  ;;  %v342_v43 = vld [vmem:[%s3296_s10 + $0x98] sm:$0xff]  ;;  %v343_v44 = vld [vmem:[%s3296_s10 + $0xa0] sm:$0xff]  ;;  %v344_v45 = vld [vmem:[%s3296_s10 + $0xa8] sm:$0xff] }
  0x97   : > { %2604 = vmatprep.subr.bf16.mxu0 %v2603_v12  ;;  %v345_v46 = vld [vmem:[%s3296_s10 + $0xb0] sm:$0xff]  ;;  %v346_v47 = vld [vmem:[%s3296_s10 + $0xb8] sm:$0xff]  ;;  %v347_v48 = vld [vmem:[%s3296_s10 + $0xc0] sm:$0xff] }
  0x98   : > { %v348_v49 = vld [vmem:[%s3296_s10 + $0xc8] sm:$0xff]  ;;  %v349_v50 = vld [vmem:[%s3296_s10 + $0xd0] sm:$0xff]  ;;  %v350_v51 = vld [vmem:[%s3296_s10 + $0xd8] sm:$0xff] }
  0x99   : > { %v351_v52 = vld [vmem:[%s3296_s10 + $0xe0] sm:$0xff]  ;;  %v352_v53 = vld [vmem:[%s3296_s10 + $0xe8] sm:$0xff]  ;;  %v353_v54 = vld [vmem:[%s3296_s10 + $0xf0] sm:$0xff] }
  0x9a   : > { %2606 = vmatpush3.bf16.msra.mxu0 %v2603_v12  ;;  %v354_v55 = vld [vmem:[%s3296_s10 + $0xf8] sm:$0xff]  ;;  %v3342_v58 = vld [vmem:[#allocation8] ss:$0 sm:$0xff] }
  0x9b   : > { %2608 = vmatprep.subr.bf16.mxu0 %v2607_v15 }
  0x9e   : > { %2610 = vmatpush3.bf16.msra.mxu0 %v2607_v15 }
  0x9f   : > { %2612 = vmatprep.subr.bf16.mxu0 %v2611_v18 }
  0xa2   : > { %2614 = vmatpush3.bf16.msra.mxu0 %v2611_v18 }
  0xa3   : > { %2616 = vmatprep.subr.bf16.mxu0 %v2615_v21 }
  0xa6   : > { %2618 = vmatpush3.bf16.msra.mxu0 %v2615_v21 }
  0xa7   : > { %2620 = vmatprep.subr.bf16.mxu0 %v2619_v24 }
  0xaa   : > { %2622 = vmatpush3.bf16.msra.mxu0 %v2619_v24 }
  0xad   : > { %2464 = vmatmul.mubr.f32.vlgmr.msra.gmra.mrb[0].mxu0 %v324_v25 }
  0xae   : > { %2466 = vmatprep.mubr.f32.mxu0 %v325_v26 }
  0xb1   : > { %2467 = vmatmul.mubr.f32.gmra.mrb[2].mxu0 %v326_v27 }
  0xb2   : > { %2469 = vmatprep.mubr.f32.mxu0 %v327_v28 }
  0xb5   : > { %2470 = vmatmul.mubr.f32.gmra.mrb[4].mxu0 %v328_v29 }
  0xb6   : > { %2472 = vmatprep.mubr.f32.mxu0 %v329_v30 }
  0xb9   : > { %2473 = vmatmul.mubr.f32.gmra.mrb[6].mxu0 %v330_v31 }
  0xba   : > { %2475 = vmatprep.mubr.f32.mxu0 %v331_v32 }
  0xbd   : > { %2476 = vmatmul.mubr.f32.gmra.mrb[8].mxu0 %v332_v33 }
  0xbe   : > { %2478 = vmatprep.mubr.f32.mxu0 %v333_v34 }
  0xc1   : > { %2479 = vmatmul.mubr.f32.gmra.mrb[10].mxu0 %v334_v35 }
  0xc2   : > { %2481 = vmatprep.mubr.f32.mxu0 %v335_v36 }
  0xc5   : > { %2482 = vmatmul.mubr.f32.gmra.mrb[12].mxu0 %v336_v37 }
  0xc6   : > { %2484 = vmatprep.mubr.f32.mxu0 %v337_v38 }
  0xc9   : > { %2485 = vmatmul.mubr.f32.gmra.mrb[14].mxu0 %v338_v39 }
  0xca   : > { %2487 = vmatprep.mubr.f32.mxu0 %v339_v40 }
  0xcd   : > { %2488 = vmatmul.mubr.f32.gmra.mrb[16].mxu0 %v340_v41 }
  0xce   : > { %2490 = vmatprep.mubr.f32.mxu0 %v341_v42 }
  0xd1   : > { %2491 = vmatmul.mubr.f32.gmra.mrb[18].mxu0 %v342_v43 }
  0xd2   : > { %2493 = vmatprep.mubr.f32.mxu0 %v343_v44 }
  0xd5   : > { %2494 = vmatmul.mubr.f32.gmra.mrb[20].mxu0 %v344_v45 }
  0xd6   : > { %2496 = vmatprep.mubr.f32.mxu0 %v345_v46 }
  0xd9   : > { %2497 = vmatmul.mubr.f32.gmra.mrb[22].mxu0 %v346_v47 }
  0xda   : > { %2499 = vmatprep.mubr.f32.mxu0 %v347_v48 }
  0xdd   : > { %2500 = vmatmul.mubr.f32.gmra.mrb[24].mxu0 %v348_v49 }
  0xde   : > { %2502 = vmatprep.mubr.f32.mxu0 %v349_v50 }
  0xe1   : > { %2503 = vmatmul.mubr.f32.gmra.mrb[26].mxu0 %v350_v51 }
  0xe2   : > { %2505 = vmatprep.mubr.f32.mxu0 %v351_v52 }
  0xe5   : > { %2506 = vmatmul.mubr.f32.gmra.mrb[28].mxu0 %v352_v53 }
  0xe6   : > { %2508 = vmatprep.mubr.f32.mxu0 %v353_v54 }
  0xe9   : > { %2509 = vmatmul.mubr.f32.gmra.mrb[30].mxu0 %v354_v55 }
 0x180   : > { %v2465_v56 = vpop.f32.mrb[0].mxu0 }
 0x181   : > { %v437_v57 = vpop.f32.mrb[1].mxu0  ;;  %v598_v60 = vmul.f32 2.0, %v2465_v56 }
 0x182   : > { %v597_v59 = vmul.f32 2.0, %v437_v57 }
 0x183   : > { %v3349_v3 = vsub.f32 %v3342_v58, %v598_v60 }
 0x184   : > { %v2468_v61 = vpop.f32.mrb[2].mxu0  ;;  %v3345_v62 = vsub.f32 %v3342_v58, %v597_v59 }
 0x185   : > { %v447_v63 = vpop.f32.mrb[3].mxu0  ;;  %v600_v1 = vmul.f32 2.0, %v2468_v61 }
 0x186   : > { %v599_v0 = vmul.f32 2.0, %v447_v63  ;;  %667 = vmin.xlane.f32.xlu0 %v3345_v62 }
 0x187   : > { %v3357_v9 = vsub.f32 %v3342_v58, %v600_v1 }
 0x188   : > { %v2471_v2 = vpop.f32.mrb[4].mxu0  ;;  %v3352_v4 = vsub.f32 %v3342_v58, %v599_v0 }
 0x189   : > { %v457_v5 = vpop.f32.mrb[5].mxu0  ;;  %v602_v7 = vmul.f32 2.0, %v2471_v2 }
 0x18a   : > { %v601_v6 = vmul.f32 2.0, %v457_v5  ;;  %669 = vmin.xlane.f32.xlu0 %v3349_v3  ;;  %671 = vmin.xlane.f32.xlu1 %v3352_v4 }
 0x18b   : > { %v3365_v15 = vsub.f32 %v3342_v58, %v602_v7 }
 0x18c   : > { %v2474_v8 = vpop.f32.mrb[6].mxu0  ;;  %v3360_v10 = vsub.f32 %v3342_v58, %v601_v6 }
 0x18d   : > { %v467_v11 = vpop.f32.mrb[7].mxu0  ;;  %v604_v13 = vmul.f32 2.0, %v2474_v8 }
 0x18e   : > { %v603_v12 = vmul.f32 2.0, %v467_v11  ;;  %673 = vmin.xlane.f32.xlu1 %v3357_v9  ;;  %675 = vmin.xlane.f32.xlu0 %v3360_v10 }
 0x18f   : > { %v3373_v21 = vsub.f32 %v3342_v58, %v604_v13 }
 0x190   : > { %v2477_v14 = vpop.f32.mrb[8].mxu0  ;;  %v3368_v16 = vsub.f32 %v3342_v58, %v603_v12 }
 0x191   : > { %v477_v17 = vpop.f32.mrb[9].mxu0  ;;  %v606_v19 = vmul.f32 2.0, %v2477_v14 }
 0x192   : > { %v605_v18 = vmul.f32 2.0, %v477_v17  ;;  %677 = vmin.xlane.f32.xlu1 %v3365_v15  ;;  %679 = vmin.xlane.f32.xlu0 %v3368_v16 }
 0x193   : > { %v3381_v27 = vsub.f32 %v3342_v58, %v606_v19 }
 0x194   : > { %v2480_v20 = vpop.f32.mrb[10].mxu0  ;;  %v3376_v22 = vsub.f32 %v3342_v58, %v605_v18 }
 0x195   : > { %v487_v23 = vpop.f32.mrb[11].mxu0  ;;  %v608_v25 = vmul.f32 2.0, %v2480_v20 }
 0x196   : > { %v607_v24 = vmul.f32 2.0, %v487_v23  ;;  %681 = vmin.xlane.f32.xlu1 %v3373_v21  ;;  %683 = vmin.xlane.f32.xlu0 %v3376_v22 }
 0x197   : > { %v3389_v33 = vsub.f32 %v3342_v58, %v608_v25 }
 0x198   : > { %v2483_v26 = vpop.f32.mrb[12].mxu0  ;;  %v3384_v28 = vsub.f32 %v3342_v58, %v607_v24 }
 0x199   : > { %v497_v29 = vpop.f32.mrb[13].mxu0  ;;  %v610_v31 = vmul.f32 2.0, %v2483_v26 }
 0x19a   : > { %v609_v30 = vmul.f32 2.0, %v497_v29  ;;  %685 = vmin.xlane.f32.xlu1 %v3381_v27  ;;  %687 = vmin.xlane.f32.xlu0 %v3384_v28 }
 0x19b   : > { %v3397_v39 = vsub.f32 %v3342_v58, %v610_v31 }
 0x19c   : > { %v2486_v32 = vpop.f32.mrb[14].mxu0  ;;  %v3392_v34 = vsub.f32 %v3342_v58, %v609_v30 }
 0x19d   : > { %v507_v35 = vpop.f32.mrb[15].mxu0  ;;  %v612_v37 = vmul.f32 2.0, %v2486_v32 }
 0x19e   : > { %v611_v36 = vmul.f32 2.0, %v507_v35  ;;  %689 = vmin.xlane.f32.xlu1 %v3389_v33  ;;  %691 = vmin.xlane.f32.xlu0 %v3392_v34 }
 0x19f   : > { %v3405_v45 = vsub.f32 %v3342_v58, %v612_v37 }
 0x1a0   : > { %v2489_v38 = vpop.f32.mrb[16].mxu0  ;;  %v3400_v40 = vsub.f32 %v3342_v58, %v611_v36 }
 0x1a1   : > { %v517_v41 = vpop.f32.mrb[17].mxu0  ;;  %v614_v43 = vmul.f32 2.0, %v2489_v38 }
 0x1a2   : > { %v613_v42 = vmul.f32 2.0, %v517_v41  ;;  %693 = vmin.xlane.f32.xlu1 %v3397_v39  ;;  %695 = vmin.xlane.f32.xlu0 %v3400_v40  ;;  %v4371_v41 = vlaneseq }
 0x1a3   : > { %v3413_v51 = vsub.f32 %v3342_v58, %v614_v43 }
 0x1a4   : > { %v2492_v44 = vpop.f32.mrb[18].mxu0  ;;  %v3408_v46 = vsub.f32 %v3342_v58, %v613_v42  ;;  %v3473_v42 = vand.u32 127, %v4371_v41 }
 0x1a5   : > { %v527_v47 = vpop.f32.mrb[19].mxu0  ;;  %v616_v49 = vmul.f32 2.0, %v2492_v44 }
 0x1a6   : > { %v615_v48 = vmul.f32 2.0, %v527_v47  ;;  %697 = vmin.xlane.f32.xlu1 %v3405_v45  ;;  %699 = vmin.xlane.f32.xlu0 %v3408_v46  ;;  %4404 = vst [vmem:[#allocation20_spill] sm:$0xff] %v3473_v42 }
 0x1a7   : > { %v3421_v57 = vsub.f32 %v3342_v58, %v616_v49 }
 0x1a8   : > { %v2495_v50 = vpop.f32.mrb[20].mxu0  ;;  %v3416_v52 = vsub.f32 %v3342_v58, %v615_v48 }
 0x1a9   : > { %v537_v53 = vpop.f32.mrb[21].mxu0  ;;  %v618_v55 = vmul.f32 2.0, %v2495_v50 }
 0x1aa   : > { %v617_v54 = vmul.f32 2.0, %v537_v53  ;;  %701 = vmin.xlane.f32.xlu1 %v3413_v51  ;;  %703 = vmin.xlane.f32.xlu0 %v3416_v52 }
 0x1ab   : > { %v3429_v1 = vsub.f32 %v3342_v58, %v618_v55 }
 0x1ac   : > { %v2498_v56 = vpop.f32.mrb[22].mxu0  ;;  %v3424_v59 = vsub.f32 %v3342_v58, %v617_v54 }
 0x1ad   : > { %v547_v60 = vpop.f32.mrb[23].mxu0  ;;  %v620_v63 = vmul.f32 2.0, %v2498_v56 }
 0x1ae   : > { %v619_v61 = vmul.f32 2.0, %v547_v60  ;;  %705 = vmin.xlane.f32.xlu1 %v3421_v57  ;;  %707 = vmin.xlane.f32.xlu0 %v3424_v59 }
 0x1af   : > { %v3437_v11 = vsub.f32 %v3342_v58, %v620_v63 }
 0x1b0   : > { %v2501_v0 = vpop.f32.mrb[24].mxu0  ;;  %v3432_v2 = vsub.f32 %v3342_v58, %v619_v61 }
 0x1b1   : > { %v557_v5 = vpop.f32.mrb[25].mxu0  ;;  %v622_v7 = vmul.f32 2.0, %v2501_v0 }
 0x1b2   : > { %v621_v6 = vmul.f32 2.0, %v557_v5  ;;  %709 = vmin.xlane.f32.xlu1 %v3429_v1  ;;  %711 = vmin.xlane.f32.xlu0 %v3432_v2 }
 0x1b3   : > { %v3445_v19 = vsub.f32 %v3342_v58, %v622_v7 }
 0x1b4   : > { %v2504_v8 = vpop.f32.mrb[26].mxu0  ;;  %v3440_v12 = vsub.f32 %v3342_v58, %v621_v6 }
 0x1b5   : > { %v567_v13 = vpop.f32.mrb[27].mxu0  ;;  %v624_v17 = vmul.f32 2.0, %v2504_v8 }
 0x1b6   : > { %v623_v14 = vmul.f32 2.0, %v567_v13  ;;  %713 = vmin.xlane.f32.xlu1 %v3437_v11  ;;  %715 = vmin.xlane.f32.xlu0 %v3440_v12 }
 0x1b7   : > { %v3453_v29 = vsub.f32 %v3342_v58, %v624_v17 }
 0x1b8   : > { %v2507_v18 = vpop.f32.mrb[28].mxu0  ;;  %v3448_v20 = vsub.f32 %v3342_v58, %v623_v14 }
 0x1b9   : > { %v577_v23 = vpop.f32.mrb[29].mxu0  ;;  %v626_v25 = vmul.f32 2.0, %v2507_v18 }
 0x1ba   : > { %v625_v24 = vmul.f32 2.0, %v577_v23  ;;  %717 = vmin.xlane.f32.xlu1 %v3445_v19  ;;  %719 = vmin.xlane.f32.xlu0 %v3448_v20 }
 0x1bb   : > { %v3464_v37 = vsub.f32 %v3342_v58, %v626_v25 }
 0x1bc   : > { %v2510_v26 = vpop.f32.mrb[30].mxu0  ;;  %v3456_v30 = vsub.f32 %v3342_v58, %v625_v24 }
 0x1bd   : > { %v628_v31 = vmul.f32 2.0, %v2510_v26  ;;  %v587_v32 = vpop.f32.mrb[31].mxu0 }
 0x1be   : > { %v627_v35 = vmul.f32 2.0, %v587_v32  ;;  %721 = vmin.xlane.f32.xlu1 %v3453_v29  ;;  %723 = vmin.xlane.f32.xlu0 %v3456_v30 }
 0x1bf   : > { %v3461_v36 = vsub.f32 %v3342_v58, %v628_v31 }
 0x1c0   : > { %v3467_v38 = vsub.f32 %v3342_v58, %v627_v35 }
 0x1c2   : > { %725 = vmin.xlane.f32.xlu1 %v3464_v37  ;;  %727 = vmin.xlane.f32.xlu0 %v3467_v38 }
 0x1c6   : > { %729 = vmin.xlane.f32.xlu1 %v3461_v36 }
 0x213   : > { %v668_v43 = vpop.xlane.xlu0 %667 }
 0x214   : > { %vm733_vm0 = vcmp.le.f32.partialorder %v3345_v62, %v668_v43 }
 0x215   : > { %v3477_v44 = vsel %vm733_vm0, %v3473_v42, 128 }
 0x216   : > { %v798_v47 = vshra.s32 %v3477_v44, 16 }
 0x217   : > { %v670_v58 = vpop.xlane.xlu0 %669  ;;  %v672_v48 = vpop.xlane.xlu1 %671 }
 0x218   : > { %vm734_vm1 = vcmp.le.f32.partialorder %v3349_v3, %v670_v58  ;;  %vm735_vm2 = vcmp.le.f32.partialorder %v3352_v4, %v672_v48  ;;  %v3482_v49 = vcvt.s32.f32 %v798_v47 }
 0x219   : > { %v3485_v50 = vsel %vm734_vm1, %v3473_v42, 128  ;;  %v3488_v53 = vsel %vm735_vm2, %v3473_v42, 128 }
 0x21a   : > { %801 = vmin.xlane.f32.xlu0 %v3482_v49  ;;  %v812_v62 = vshra.s32 %v3485_v50, 16  ;;  %v826_v54 = vshra.s32 %v3488_v53, 16 }
 0x21b   : > { %v674_v55 = vpop.xlane.xlu1 %673  ;;  %v676_v56 = vpop.xlane.xlu0 %675 }
 0x21c   : > { %vm736_vm3 = vcmp.le.f32.partialorder %v3357_v9, %v674_v55  ;;  %vm737_vm4 = vcmp.le.f32.partialorder %v3360_v10, %v676_v56  ;;  %v3495_v3 = vcvt.s32.f32 %v812_v62  ;;  %v3497_v4 = vcvt.s32.f32 %v826_v54 }
 0x21d   : > { %v3500_v60 = vsel %vm736_vm3, %v3473_v42, 128  ;;  %v3503_v61 = vsel %vm737_vm4, %v3473_v42, 128 }
 0x21e   : > { %815 = vmin.xlane.f32.xlu1 %v3495_v3  ;;  %829 = vmin.xlane.f32.xlu0 %v3497_v4  ;;  %v840_v63 = vshra.s32 %v3500_v60, 16  ;;  %v854_v9 = vshra.s32 %v3503_v61, 16 }
 0x21f   : > { %v678_v0 = vpop.xlane.xlu1 %677  ;;  %v680_v10 = vpop.xlane.xlu0 %679 }
 0x220   : > { %vm738_vm5 = vcmp.le.f32.partialorder %v3365_v15, %v678_v0  ;;  %vm739_vm6 = vcmp.le.f32.partialorder %v3368_v16, %v680_v10  ;;  %v3511_v5 = vcvt.s32.f32 %v840_v63  ;;  %v3513_v6 = vcvt.s32.f32 %v854_v9 }
 0x221   : > { %v3516_v7 = vsel %vm738_vm5, %v3473_v42, 128  ;;  %v3519_v8 = vsel %vm739_vm6, %v3473_v42, 128 }
 0x222   : > { %843 = vmin.xlane.f32.xlu1 %v3511_v5  ;;  %857 = vmin.xlane.f32.xlu0 %v3513_v6  ;;  %v868_v13 = vshra.s32 %v3516_v7, 16  ;;  %v882_v15 = vshra.s32 %v3519_v8, 16 }
 0x223   : > { %v682_v14 = vpop.xlane.xlu1 %681  ;;  %v684_v16 = vpop.xlane.xlu0 %683 }
 0x224   : > { %vm740_vm7 = vcmp.le.f32.partialorder %v3373_v21, %v682_v14  ;;  %vm741_vm8 = vcmp.le.f32.partialorder %v3376_v22, %v684_v16  ;;  %v3527_v17 = vcvt.s32.f32 %v868_v13  ;;  %v3529_v18 = vcvt.s32.f32 %v882_v15 }
 0x225   : > { %v3532_v23 = vsel %vm740_vm7, %v3473_v42, 128  ;;  %v3535_v24 = vsel %vm741_vm8, %v3473_v42, 128 }
 0x226   : > { %871 = vmin.xlane.f32.xlu1 %v3527_v17  ;;  %885 = vmin.xlane.f32.xlu0 %v3529_v18  ;;  %v896_v25 = vshra.s32 %v3532_v23, 16  ;;  %v910_v21 = vshra.s32 %v3535_v24, 16 }
 0x227   : > { %v686_v26 = vpop.xlane.xlu1 %685  ;;  %v688_v22 = vpop.xlane.xlu0 %687 }
 0x228   : > { %vm742_vm9 = vcmp.le.f32.partialorder %v3381_v27, %v686_v26  ;;  %vm743_vm10 = vcmp.le.f32.partialorder %v3384_v28, %v688_v22  ;;  %v3543_v31 = vcvt.s32.f32 %v896_v25  ;;  %v3545_v32 = vcvt.s32.f32 %v910_v21 }
 0x229   : > { %v3548_v35 = vsel %vm742_vm9, %v3473_v42, 128  ;;  %v3551_v43 = vsel %vm743_vm10, %v3473_v42, 128 }
 0x22a   : > { %899 = vmin.xlane.f32.xlu1 %v3543_v31  ;;  %913 = vmin.xlane.f32.xlu0 %v3545_v32  ;;  %v924_v47 = vshra.s32 %v3548_v35, 16  ;;  %v938_v27 = vshra.s32 %v3551_v43, 16 }
 0x22b   : > { %v690_v58 = vpop.xlane.xlu1 %689  ;;  %v692_v28 = vpop.xlane.xlu0 %691 }
 0x22c   : > { %vm744_vm11 = vcmp.le.f32.partialorder %v3389_v33, %v690_v58  ;;  %vm745_vm12 = vcmp.le.f32.partialorder %v3392_v34, %v692_v28  ;;  %v3559_v48 = vcvt.s32.f32 %v924_v47  ;;  %v3561_v62 = vcvt.s32.f32 %v938_v27 }
 0x22d   : > { %v3564_v54 = vsel %vm744_vm11, %v3473_v42, 128  ;;  %v3567_v55 = vsel %vm745_vm12, %v3473_v42, 128 }
 0x22e   : > { %927 = vmin.xlane.f32.xlu1 %v3559_v48  ;;  %941 = vmin.xlane.f32.xlu0 %v3561_v62  ;;  %v952_v56 = vshra.s32 %v3564_v54, 16  ;;  %v966_v33 = vshra.s32 %v3567_v55, 16 }
 0x22f   : > { %v694_v63 = vpop.xlane.xlu1 %693  ;;  %v696_v34 = vpop.xlane.xlu0 %695 }
 0x230   : > { %vm746_vm13 = vcmp.le.f32.partialorder %v3397_v39, %v694_v63  ;;  %vm747_vm14 = vcmp.le.f32.partialorder %v3400_v40, %v696_v34  ;;  %v3575_v9 = vcvt.s32.f32 %v952_v56  ;;  %v3577_v0 = vcvt.s32.f32 %v966_v33 }
 0x231   : > { %v3580_v10 = vsel %vm746_vm13, %v3473_v42, 128  ;;  %v3583_v13 = vsel %vm747_vm14, %v3473_v42, 128 }
 0x232   : > { %955 = vmin.xlane.f32.xlu1 %v3575_v9  ;;  %969 = vmin.xlane.f32.xlu0 %v3577_v0  ;;  %v980_v15 = vshra.s32 %v3580_v10, 16  ;;  %v994_v39 = vshra.s32 %v3583_v13, 16 }
 0x233   : > { %v698_v14 = vpop.xlane.xlu1 %697  ;;  %v700_v40 = vpop.xlane.xlu0 %699 }
 0x234   : > { %vm748_vm15 = vcmp.le.f32.partialorder %v3405_v45, %v698_v14  ;;  %vm749_vm0 = vcmp.le.f32.partialorder %v3408_v46, %v700_v40  ;;  %v3591_v16 = vcvt.s32.f32 %v980_v15  ;;  %v3593_v25 = vcvt.s32.f32 %v994_v39 }
 0x235   : > { %v3596_v21 = vsel %vm748_vm15, %v3473_v42, 128  ;;  %v3599_v26 = vsel %vm749_vm0, %v3473_v42, 128 }
 0x236   : > { %983 = vmin.xlane.f32.xlu1 %v3591_v16  ;;  %997 = vmin.xlane.f32.xlu0 %v3593_v25  ;;  %v1008_v22 = vshra.s32 %v3596_v21, 16  ;;  %v1022_v45 = vshra.s32 %v3599_v26, 16 }
 0x237   : > { %v702_v47 = vpop.xlane.xlu1 %701  ;;  %v704_v46 = vpop.xlane.xlu0 %703 }
 0x238   : > { %vm750_vm1 = vcmp.le.f32.partialorder %v3413_v51, %v702_v47  ;;  %vm751_vm2 = vcmp.le.f32.partialorder %v3416_v52, %v704_v46  ;;  %v3607_v27 = vcvt.s32.f32 %v1008_v22  ;;  %v3609_v58 = vcvt.s32.f32 %v1022_v45 }
 0x239   : > { %v3612_v28 = vsel %vm750_vm1, %v3473_v42, 128  ;;  %v3615_v56 = vsel %vm751_vm2, %v3473_v42, 128 }
 0x23a   : > { %1011 = vmin.xlane.f32.xlu1 %v3607_v27  ;;  %1025 = vmin.xlane.f32.xlu0 %v3609_v58  ;;  %v1036_v33 = vshra.s32 %v3612_v28, 16  ;;  %v1050_v51 = vshra.s32 %v3615_v56, 16 }
 0x23b   : > { %v706_v63 = vpop.xlane.xlu1 %705  ;;  %v708_v52 = vpop.xlane.xlu0 %707 }
 0x23c   : > { %vm752_vm3 = vcmp.le.f32.partialorder %v3421_v57, %v706_v63  ;;  %vm753_vm4 = vcmp.le.f32.partialorder %v3424_v59, %v708_v52  ;;  %v3623_v34 = vcvt.s32.f32 %v1036_v33  ;;  %v3625_v15 = vcvt.s32.f32 %v1050_v51 }
 0x23d   : > { %v3628_v39 = vsel %vm752_vm3, %v3473_v42, 128  ;;  %v3631_v14 = vsel %vm753_vm4, %v3473_v42, 128 }
 0x23e   : > { %1039 = vmin.xlane.f32.xlu1 %v3623_v34  ;;  %1053 = vmin.xlane.f32.xlu0 %v3625_v15  ;;  %v1064_v40 = vshra.s32 %v3628_v39, 16  ;;  %v1078_v57 = vshra.s32 %v3631_v14, 16 }
 0x23f   : > { %v710_v22 = vpop.xlane.xlu1 %709  ;;  %v712_v59 = vpop.xlane.xlu0 %711 }
 0x240   : > { %vm754_vm5 = vcmp.le.f32.partialorder %v3429_v1, %v710_v22  ;;  %vm755_vm6 = vcmp.le.f32.partialorder %v3432_v2, %v712_v59  ;;  %v3639_v45 = vcvt.s32.f32 %v1064_v40  ;;  %v3641_v47 = vcvt.s32.f32 %v1078_v57 }
 0x241   : > { %v3644_v46 = vsel %vm754_vm5, %v3473_v42, 128  ;;  %v3647_v33 = vsel %vm755_vm6, %v3473_v42, 128 }
 0x242   : > { %1067 = vmin.xlane.f32.xlu1 %v3639_v45  ;;  %1081 = vmin.xlane.f32.xlu0 %v3641_v47  ;;  %v1092_v51 = vshra.s32 %v3644_v46, 16  ;;  %v1106_v1 = vshra.s32 %v3647_v33, 16 }
 0x243   : > { %v714_v63 = vpop.xlane.xlu1 %713  ;;  %v716_v2 = vpop.xlane.xlu0 %715 }
 0x244   : > { %vm756_vm7 = vcmp.le.f32.partialorder %v3437_v11, %v714_v63  ;;  %vm757_vm8 = vcmp.le.f32.partialorder %v3440_v12, %v716_v2  ;;  %v3655_v52 = vcvt.s32.f32 %v1092_v51  ;;  %v3657_v40 = vcvt.s32.f32 %v1106_v1 }
 0x245   : > { %v3660_v57 = vsel %vm756_vm7, %v3473_v42, 128  ;;  %v3663_v22 = vsel %vm757_vm8, %v3473_v42, 128 }
 0x246   : > { %4405 = vst [vmem:[#allocation21_spill] sm:$0xff] %v3657_v40  ;;  %1095 = vmin.xlane.f32.xlu1 %v3655_v52  ;;  %1109 = vmin.xlane.f32.xlu0 %v3657_v40  ;;  %v1120_v59 = vshra.s32 %v3660_v57, 16  ;;  %v1134_v11 = vshra.s32 %v3663_v22, 16 }
 0x247   : > { %v718_v63 = vpop.xlane.xlu1 %717  ;;  %v720_v12 = vpop.xlane.xlu0 %719 }
 0x248   : > { %vm758_vm9 = vcmp.le.f32.partialorder %v3445_v19, %v718_v63  ;;  %vm759_vm10 = vcmp.le.f32.partialorder %v3448_v20, %v720_v12  ;;  %v3671_v51 = vcvt.s32.f32 %v1120_v59  ;;  %v3673_v1 = vcvt.s32.f32 %v1134_v11 }
 0x249   : > { %v3676_v2 = vsel %vm758_vm9, %v3473_v42, 128  ;;  %v3679_v41 = vsel %vm759_vm10, %v3473_v42, 128 }
 0x24a   : > { %4406 = vst [vmem:[#allocation22_spill] sm:$0xff] %v3671_v51  ;;  %4407 = vst [vmem:[#allocation23_spill] sm:$0xff] %v3673_v1  ;;  %1123 = vmin.xlane.f32.xlu1 %v3671_v51  ;;  %1137 = vmin.xlane.f32.xlu0 %v3673_v1  ;;  %v1148_v40 = vshra.s32 %v3676_v2, 16  ;;  %v1162_v19 = vshra.s32 %v3679_v41, 16 }
 0x24b   : > { %4408 = vst [vmem:[#allocation24_spill] sm:$0xff] %v3679_v41  ;;  %v722_v63 = vpop.xlane.xlu1 %721  ;;  %v724_v20 = vpop.xlane.xlu0 %723  ;;  %v1384_v41 = vld [vmem:[#allocation7 + $0x50] sm:$0xff] }
 0x24c   : > { %vm760_vm11 = vcmp.le.f32.partialorder %v3453_v29, %v722_v63  ;;  %vm761_vm12 = vcmp.le.f32.partialorder %v3456_v30, %v724_v20  ;;  %v3687_v59 = vcvt.s32.f32 %v1148_v40  ;;  %v3689_v11 = vcvt.s32.f32 %v1162_v19 }
 0x24d   : > { %v3692_v12 = vsel %vm760_vm11, %v3473_v42, 128  ;;  %v3695_v51 = vsel %vm761_vm12, %v3473_v42, 128 }
 0x24e   : > { %4409 = vst [vmem:[#allocation25_spill] sm:$0xff] %v3687_v59  ;;  %4410 = vst [vmem:[#allocation26_spill] sm:$0xff] %v3689_v11  ;;  %1151 = vmin.xlane.f32.xlu1 %v3687_v59  ;;  %1165 = vmin.xlane.f32.xlu0 %v3689_v11  ;;  %v1176_v1 = vshra.s32 %v3692_v12, 16  ;;  %v1190_v29 = vshra.s32 %v3695_v51, 16 }
 0x24f   : > { %4411 = vst [vmem:[#allocation27_spill] sm:$0xff] %v3692_v12  ;;  %4412 = vst [vmem:[#allocation28_spill] sm:$0xff] %v3695_v51  ;;  %v726_v63 = vpop.xlane.xlu1 %725  ;;  %v728_v30 = vpop.xlane.xlu0 %727  ;;  %v1379_v51 = vld [vmem:[#allocation7 + $0x28] sm:$0xff] }
 0x250   : > { %vm762_vm13 = vcmp.le.f32.partialorder %v3464_v37, %v726_v63  ;;  %vm763_vm14 = vcmp.le.f32.partialorder %v3467_v38, %v728_v30  ;;  %v3703_v40 = vcvt.s32.f32 %v1176_v1  ;;  %v3705_v19 = vcvt.s32.f32 %v1190_v29  ;;  %v1383_v12 = vld [vmem:[#allocation7 + $0x48] sm:$0xff] }
 0x251   : > { %v3708_v20 = vsel %vm762_vm13, %v3473_v42, 128  ;;  %v3711_v59 = vsel %vm763_vm14, %v3473_v42, 128 }
 0x252   : > { %4413 = vst [vmem:[#allocation29_spill] sm:$0xff] %v3703_v40  ;;  %4414 = vst [vmem:[#allocation30_spill] sm:$0xff] %v3705_v19  ;;  %1179 = vmin.xlane.f32.xlu1 %v3703_v40  ;;  %1193 = vmin.xlane.f32.xlu0 %v3705_v19  ;;  %v1204_v11 = vshra.s32 %v3708_v20, 16  ;;  %v1218_v37 = vshra.s32 %v3711_v59, 16  ;;  %v1374_v40 = vld [vmem:[#allocation7] sm:$0xff] }
 0x253   : > { %4415 = vst [vmem:[#allocation31_spill] sm:$0xff] %v3708_v20  ;;  %4416 = vst [vmem:[#allocation32_spill] sm:$0xff] %v3711_v59  ;;  %v730_v63 = vpop.xlane.xlu1 %729  ;;  %v1375_v20 = vld [vmem:[#allocation7 + $0x8] sm:$0xff]  ;;  %v1378_v59 = vld [vmem:[#allocation7 + $0x20] sm:$0xff] }
 0x254   : > { %vm764_vm15 = vcmp.le.f32.partialorder %v3461_v36, %v730_v63  ;;  %v3718_v38 = vcvt.s32.f32 %v1204_v11  ;;  %v3720_v1 = vcvt.s32.f32 %v1218_v37  ;;  %v1376_v36 = vld [vmem:[#allocation7 + $0x10] sm:$0xff]  ;;  %v2623_v11 = vpack.c.bf16 %v1375_v20, %v1374_v40  ;;  %v1377_v63 = vld [vmem:[#allocation7 + $0x18] sm:$0xff] }
 0x255   : > { %v3723_v29 = vsel %vm764_vm15, %v3473_v42, 128  ;;  %v2627_v37 = vpack.c.bf16 %v1377_v63, %v1376_v36  ;;  %v2631_v42 = vpack.c.bf16 %v1379_v51, %v1378_v59  ;;  %v1385_v40 = vld [vmem:[#allocation7 + $0x58] sm:$0xff]  ;;  %v797_v51 = vand.u32 65535, %v3477_v44 }
 0x256   : > { %4417 = vst [vmem:[#allocation33_spill] sm:$0xff] %v3718_v38  ;;  %4418 = vst [vmem:[#allocation34_spill] sm:$0xff] %v3720_v1  ;;  %1207 = vmin.xlane.f32.xlu1 %v3718_v38  ;;  %1221 = vmin.xlane.f32.xlu0 %v3720_v1  ;;  %v1232_v30 = vshra.s32 %v3723_v29, 16  ;;  %v1380_v38 = vld [vmem:[#allocation7 + $0x30] sm:$0xff]  ;;  %v1381_v1 = vld [vmem:[#allocation7 + $0x38] sm:$0xff]  ;;  %v2643_v20 = vpack.c.bf16 %v1385_v40, %v1384_v41  ;;  %v839_v44 = vand.u32 65535, %v3500_v60 }
 0x257   : > { %4419 = vst [vmem:[#allocation35_spill] sm:$0xff] %v3723_v29  ;;  %2624 = vmatprep.subr.bf16.mxu1 %v2623_v11  ;;  %v1382_v29 = vld [vmem:[#allocation7 + $0x40] sm:$0xff]  ;;  %v799_v36 = vcvt.s32.f32 %v797_v51  ;;  %v867_v60 = vand.u32 65535, %v3516_v7  ;;  %v895_v7 = vand.u32 65535, %v3532_v23  ;;  %v923_v23 = vand.u32 65535, %v3548_v35 }
 0x258   : > { %v3728_v19 = vcvt.s32.f32 %v1232_v30  ;;  %2626 = vmatpush3.bf16.msra.mxu1 %v2623_v11  ;;  %v2635_v30 = vpack.c.bf16 %v1381_v1, %v1380_v38  ;;  %v811_v38 = vand.u32 65535, %v3485_v50  ;;  %v825_v1 = vand.u32 65535, %v3488_v53 }
 0x259   : > { %2628 = vmatprep.subr.bf16.mxu1 %v2627_v37  ;;  %v853_v11 = vand.u32 65535, %v3503_v61  ;;  %v881_v61 = vand.u32 65535, %v3519_v8  ;;  %v869_v51 = vcvt.s32.f32 %v867_v60  ;;  %v909_v8 = vand.u32 65535, %v3535_v24  ;;  %v1389_v60 = vld [vmem:[#allocation7 + $0x78] sm:$0xff] }
 0x25a   : > { %4420 = vst [vmem:[#allocation36_spill] sm:$0xff] %v3728_v19  ;;  %1235 = vmin.xlane.f32.xlu1 %v3728_v19  ;;  %v2639_v19 = vpack.c.bf16 %v1383_v12, %v1382_v29  ;;  %v827_v29 = vcvt.s32.f32 %v825_v1  ;;  %v937_v24 = vand.u32 65535, %v3551_v43  ;;  %v925_v35 = vcvt.s32.f32 %v923_v23 }
 0x25b   : > { %v951_v43 = vand.u32 65535, %v3564_v54 }
 0x25c   : > { %2630 = vmatpush3.bf16.msra.mxu1 %v2627_v37  ;;  %v841_v37 = vcvt.s32.f32 %v839_v44  ;;  %v1387_v44 = vld [vmem:[#allocation7 + $0x68] sm:$0xff] }
 0x25d   : > { %2632 = vmatprep.subr.bf16.mxu1 %v2631_v42 }
 0x260   : > { %2634 = vmatpush3.bf16.msra.mxu1 %v2631_v42 }
 0x261   : > { %2636 = vmatprep.subr.bf16.mxu1 %v2635_v30 }
 0x264   : > { %2638 = vmatpush3.bf16.msra.mxu1 %v2635_v30  ;;  %v855_v30 = vcvt.s32.f32 %v853_v11 }
 0x265   : > { %2640 = vmatprep.subr.bf16.mxu1 %v2639_v19 }
 0x268   : > { %2642 = vmatpush3.bf16.msra.mxu1 %v2639_v19  ;;  %v813_v19 = vcvt.s32.f32 %v811_v38 }
 0x269   : > { %2644 = vmatprep.subr.bf16.mxu1 %v2643_v20 }
 0x26c   : > { %2646 = vmatpush3.bf16.msra.mxu1 %v2643_v20 }
 0x2a7   : > { %v3732_v59 = vpop.xlane.xlu0 %801 }
 0x2a8   : > { %vm803_vm0 = vcmp.eq.f32.partialorder %v3482_v49, %v3732_v59 }
 0x2a9   : > { %v804_v42 = vsel %vm803_vm0, %v799_v36, inf  ;;  %v883_v36 = vcvt.s32.f32 %v881_v61 }
 0x2aa   : > { %805 = vmin.xlane.f32.xlu0 %v804_v42  ;;  %v897_v42 = vcvt.s32.f32 %v895_v7  ;;  %v993_v7 = vand.u32 65535, %v3583_v13  ;;  %v1007_v13 = vand.u32 65535, %v3596_v21  ;;  %v1035_v21 = vand.u32 65535, %v3612_v28 }
 0x2ab   : > { %v3738_v12 = vpop.xlane.xlu1 %815  ;;  %v3740_v41 = vpop.xlane.xlu0 %829  ;;  %v1063_v28 = vand.u32 65535, %v3628_v39  ;;  %v1091_v39 = vand.u32 65535, %v3644_v46  ;;  %v1119_v46 = vand.u32 65535, %v3660_v57  ;;  %v1147_v57 = vand.u32 65535, %v3676_v2 }
 0x2ac   : > { %vm817_vm1 = vcmp.eq.f32.partialorder %v3495_v3, %v3738_v12  ;;  %vm831_vm2 = vcmp.eq.f32.partialorder %v3497_v4, %v3740_v41 }
 0x2ad   : > { %v818_v50 = vsel %vm817_vm1, %v813_v19, inf  ;;  %v832_v49 = vsel %vm831_vm2, %v827_v29, inf  ;;  %v911_v19 = vcvt.s32.f32 %v909_v8  ;;  %v1386_v29 = vld [vmem:[#allocation7 + $0x60] sm:$0xff] }
 0x2ae   : > { %819 = vmin.xlane.f32.xlu1 %v818_v50  ;;  %833 = vmin.xlane.f32.xlu0 %v832_v49  ;;  %v2647_v11 = vpack.c.bf16 %v1387_v44, %v1386_v29 }
 0x2af   : > { %v3748_v53 = vpop.xlane.xlu1 %843  ;;  %v3750_v63 = vpop.xlane.xlu0 %857 }
 0x2b0   : > { %vm845_vm3 = vcmp.eq.f32.partialorder %v3511_v5, %v3748_v53  ;;  %vm859_vm4 = vcmp.eq.f32.partialorder %v3513_v6, %v3750_v63  ;;  %2648 = vmatprep.subr.bf16.mxu1 %v2647_v11 }
 0x2b1   : > { %v846_v3 = vsel %vm845_vm3, %v841_v37, inf  ;;  %v860_v4 = vsel %vm859_vm4, %v855_v30, inf  ;;  %v939_v37 = vcvt.s32.f32 %v937_v24  ;;  %v965_v30 = vand.u32 65535, %v3567_v55  ;;  %2650 = vmatpush3.bf16.msra.mxu1 %v2647_v11 }
 0x2b2   : > { %847 = vmin.xlane.f32.xlu1 %v846_v3  ;;  %861 = vmin.xlane.f32.xlu0 %v860_v4  ;;  %v953_v55 = vcvt.s32.f32 %v951_v43  ;;  %v1009_v24 = vcvt.s32.f32 %v1007_v13  ;;  %v1065_v43 = vcvt.s32.f32 %v1063_v28 }
 0x2b3   : > { %v3758_v40 = vpop.xlane.xlu1 %871  ;;  %v3760_v20 = vpop.xlane.xlu0 %885 }
 0x2b4   : > { %vm873_vm5 = vcmp.eq.f32.partialorder %v3527_v17, %v3758_v40  ;;  %vm887_vm6 = vcmp.eq.f32.partialorder %v3529_v18, %v3760_v20 }
 0x2b5   : > { %v874_v5 = vsel %vm873_vm5, %v869_v51, inf  ;;  %v888_v6 = vsel %vm887_vm6, %v883_v36, inf  ;;  %v967_v51 = vcvt.s32.f32 %v965_v30  ;;  %v979_v36 = vand.u32 65535, %v3580_v10 }
 0x2b6   : > { %875 = vmin.xlane.f32.xlu1 %v874_v5  ;;  %889 = vmin.xlane.f32.xlu0 %v888_v6  ;;  %v995_v10 = vcvt.s32.f32 %v993_v7 }
 0x2b7   : > { %v3768_v38 = vpop.xlane.xlu1 %899  ;;  %v3770_v1 = vpop.xlane.xlu0 %913  ;;  %v981_v6 = vcvt.s32.f32 %v979_v36  ;;  %v1121_v36 = vcvt.s32.f32 %v1119_v46 }
 0x2b8   : > { %vm901_vm7 = vcmp.eq.f32.partialorder %v3543_v31, %v3768_v38  ;;  %vm915_vm8 = vcmp.eq.f32.partialorder %v3545_v32, %v3770_v1  ;;  %v1388_v31 = vld [vmem:[#allocation7 + $0x70] sm:$0xff] }
 0x2b9   : > { %v902_v17 = vsel %vm901_vm7, %v897_v42, inf  ;;  %v916_v18 = vsel %vm915_vm8, %v911_v19, inf  ;;  %v2651_v3 = vpack.c.bf16 %v1389_v60, %v1388_v31  ;;  %v1021_v42 = vand.u32 65535, %v3599_v26 }
 0x2ba   : > { %903 = vmin.xlane.f32.xlu1 %v902_v17  ;;  %917 = vmin.xlane.f32.xlu0 %v916_v18  ;;  %v1049_v26 = vand.u32 65535, %v3615_v56  ;;  %v1037_v18 = vcvt.s32.f32 %v1035_v21  ;;  %v1077_v56 = vand.u32 65535, %v3631_v14  ;;  %v1105_v14 = vand.u32 65535, %v3647_v33 }
 0x2bb   : > { %v3778_v50 = vpop.xlane.xlu1 %927  ;;  %v3780_v49 = vpop.xlane.xlu0 %941  ;;  %2652 = vmatprep.subr.bf16.mxu1 %v2651_v3  ;;  %v1023_v29 = vcvt.s32.f32 %v1021_v42  ;;  %v1133_v33 = vand.u32 65535, %v3663_v22 }
 0x2bc   : > { %vm929_vm9 = vcmp.eq.f32.partialorder %v3559_v48, %v3778_v50  ;;  %vm943_vm10 = vcmp.eq.f32.partialorder %v3561_v62, %v3780_v49  ;;  %2654 = vmatpush3.bf16.msra.mxu1 %v2651_v3  ;;  %v1051_v11 = vcvt.s32.f32 %v1049_v26  ;;  %v1079_v30 = vcvt.s32.f32 %v1077_v56  ;;  %v4427_v26 = vld [vmem:[#allocation25_spill] sm:$0xff] }
 0x2bd   : > { %v930_v32 = vsel %vm929_vm9, %v925_v35, inf  ;;  %v944_v61 = vsel %vm943_vm10, %v939_v37, inf  ;;  %v1135_v7 = vcvt.s32.f32 %v1133_v33 }
 0x2be   : > { %931 = vmin.xlane.f32.xlu1 %v930_v32  ;;  %945 = vmin.xlane.f32.xlu0 %v944_v61  ;;  %v1093_v32 = vcvt.s32.f32 %v1091_v39  ;;  %v1107_v61 = vcvt.s32.f32 %v1105_v14  ;;  %v4431_v14 = vld [vmem:[#allocation29_spill] sm:$0xff] }
 0x2bf   : > { %v3788_v4 = vpop.xlane.xlu1 %955  ;;  %v3790_v54 = vpop.xlane.xlu0 %969 }
 0x2c0   : > { %vm957_vm11 = vcmp.eq.f32.partialorder %v3575_v9, %v3788_v4  ;;  %vm971_vm12 = vcmp.eq.f32.partialorder %v3577_v0, %v3790_v54 }
 0x2c1   : > { %v958_v48 = vsel %vm957_vm11, %v953_v55, inf  ;;  %v972_v62 = vsel %vm971_vm12, %v967_v51, inf }
 0x2c2   : > { %959 = vmin.xlane.f32.xlu1 %v958_v48  ;;  %973 = vmin.xlane.f32.xlu0 %v972_v62  ;;  %v4422_v48 = vld [vmem:[#allocation24_spill] sm:$0xff]  ;;  %v4423_v62 = vld [vmem:[#allocation22_spill] sm:$0xff] }
 0x2c3   : > { %v3798_v8 = vpop.xlane.xlu1 %983  ;;  %v3800_v5 = vpop.xlane.xlu0 %997  ;;  %v1161_v22 = vand.u32 65535, %v4422_v48 }
 0x2c4   : > { %vm985_vm13 = vcmp.eq.f32.partialorder %v3591_v16, %v3798_v8  ;;  %vm999_vm14 = vcmp.eq.f32.partialorder %v3593_v25, %v3800_v5 }
 0x2c5   : > { %v986_v9 = vsel %vm985_vm13, %v981_v6, inf  ;;  %v1000_v0 = vsel %vm999_vm14, %v995_v10, inf }
 0x2c6   : > { %987 = vmin.xlane.f32.xlu1 %v986_v9  ;;  %1001 = vmin.xlane.f32.xlu0 %v1000_v0  ;;  %v1149_v9 = vcvt.s32.f32 %v1147_v57  ;;  %v1163_v0 = vcvt.s32.f32 %v1161_v22 }
 0x2c7   : > { %v3808_v19 = vpop.xlane.xlu1 %1011  ;;  %v3810_v23 = vpop.xlane.xlu0 %1025 }
 0x2c8   : > { %vm1013_vm15 = vcmp.eq.f32.partialorder %v3607_v27, %v3808_v19  ;;  %vm1027_vm0 = vcmp.eq.f32.partialorder %v3609_v58, %v3810_v23 }
 0x2c9   : > { %v1014_v16 = vsel %vm1013_vm15, %v1009_v24, inf  ;;  %v1028_v25 = vsel %vm1027_vm0, %v1023_v29, inf  ;;  %v4425_v24 = vld [vmem:[#allocation27_spill] sm:$0xff]  ;;  %v4426_v29 = vld [vmem:[#allocation28_spill] sm:$0xff]  ;;  %vm1245_vm0 = vcmask 7168  }
 0x2ca   : > { %1015 = vmin.xlane.f32.xlu1 %v1014_v16  ;;  %1029 = vmin.xlane.f32.xlu0 %v1028_v25  ;;  %v1175_v2 = vand.u32 65535, %v4425_v24  ;;  %v1189_v21 = vand.u32 65535, %v4426_v29  ;;  %v4428_v16 = vld [vmem:[#allocation26_spill] sm:$0xff] }
 0x2cb   : > { %v3818_v44 = vpop.xlane.xlu1 %1039  ;;  %v3820_v17 = vpop.xlane.xlu0 %1053 }
 0x2cc   : > { %vm1041_vm1 = vcmp.eq.f32.partialorder %v3623_v34, %v3818_v44  ;;  %vm1055_vm2 = vcmp.eq.f32.partialorder %v3625_v15, %v3820_v17 }
 0x2cd   : > { %v1042_v27 = vsel %vm1041_vm1, %v1037_v18, inf  ;;  %v1056_v58 = vsel %vm1055_vm2, %v1051_v11, inf  ;;  %v4429_v11 = vld [vmem:[#allocation32_spill] sm:$0xff] }
 0x2ce   : > { %1043 = vmin.xlane.f32.xlu1 %v1042_v27  ;;  %1057 = vmin.xlane.f32.xlu0 %v1056_v58  ;;  %v1217_v28 = vand.u32 65535, %v4429_v11  ;;  %v1177_v58 = vcvt.s32.f32 %v1175_v2  ;;  %v836_v2 = vcvt.f32.s32 %v3740_v41  ;;  %v3041_v41 = vmov 1.0  }
 0x2cf   : > { %v3828_v35 = vpop.xlane.xlu1 %1067  ;;  %v3830_v37 = vpop.xlane.xlu0 %1081 }
 0x2d0   : > { %vm1069_vm3 = vcmp.eq.f32.partialorder %v3639_v45, %v3828_v35  ;;  %vm1083_vm4 = vcmp.eq.f32.partialorder %v3641_v47, %v3830_v37  ;;  %v4421_v45 = vld [vmem:[#allocation21_spill] sm:$0xff] }
 0x2d1   : > { %v1070_v34 = vsel %vm1069_vm3, %v1065_v43, inf  ;;  %v1084_v15 = vsel %vm1083_vm4, %v1079_v30, inf  ;;  %v1191_v43 = vcvt.s32.f32 %v1189_v21  ;;  %v4430_v30 = vld [vmem:[#allocation31_spill] sm:$0xff] }
 0x2d2   : > { %1071 = vmin.xlane.f32.xlu1 %v1070_v34  ;;  %1085 = vmin.xlane.f32.xlu0 %v1084_v15  ;;  %v1203_v39 = vand.u32 65535, %v4430_v30  ;;  %v4432_v34 = vld [vmem:[#allocation30_spill] sm:$0xff] }
 0x2d3   : > { %v3838_v31 = vpop.xlane.xlu1 %1095  ;;  %v3840_v60 = vpop.xlane.xlu0 %1109 }
 0x2d4   : > { %vm1097_vm5 = vcmp.eq.f32.partialorder %v3655_v52, %v3838_v31  ;;  %vm1111_vm6 = vcmp.eq.f32.partialorder %v4421_v45, %v3840_v60  ;;  %v4424_v52 = vld [vmem:[#allocation23_spill] sm:$0xff] }
 0x2d5   : > { %v1098_v47 = vsel %vm1097_vm5, %v1093_v32, inf  ;;  %v1112_v3 = vsel %vm1111_vm6, %v1107_v61, inf  ;;  %v4433_v61 = vld [vmem:[#allocation35_spill] sm:$0xff] }
 0x2d6   : > { %1099 = vmin.xlane.f32.xlu1 %v1098_v47  ;;  %1113 = vmin.xlane.f32.xlu0 %v1112_v3  ;;  %v1231_v46 = vand.u32 65535, %v4433_v61  ;;  %v1205_v47 = vcvt.s32.f32 %v1203_v39  ;;  %v1219_v3 = vcvt.s32.f32 %v1217_v28  ;;  %v837_v28 = vshll.u32 %v836_v2, 16 }
 0x2d7   : > { %v3848_v55 = vpop.xlane.xlu1 %1123  ;;  %v3850_v51 = vpop.xlane.xlu0 %1137  ;;  %v878_v39 = vcvt.f32.s32 %v3758_v40 }
 0x2d8   : > { %vm1125_vm7 = vcmp.eq.f32.partialorder %v4423_v62, %v3848_v55  ;;  %vm1139_vm8 = vcmp.eq.f32.partialorder %v4424_v52, %v3850_v51  ;;  %v1233_v62 = vcvt.s32.f32 %v1231_v46  ;;  %v4436_v52 = vld [vmem:[#allocation36_spill] sm:$0xff] }
 0x2d9   : > { %v1126_v6 = vsel %vm1125_vm7, %v1121_v36, inf  ;;  %v1140_v10 = vsel %vm1139_vm8, %v1135_v7, inf  ;;  %v4434_v36 = vld [vmem:[#allocation33_spill] sm:$0xff]  ;;  %v4435_v7 = vld [vmem:[#allocation34_spill] sm:$0xff] }
 0x2da   : > { %1127 = vmin.xlane.f32.xlu1 %v1126_v6  ;;  %1141 = vmin.xlane.f32.xlu0 %v1140_v10  ;;  %v808_v10 = vcvt.f32.s32 %v3732_v59 }
 0x2db   : > { %v3858_v13 = vpop.xlane.xlu1 %1151  ;;  %v3860_v42 = vpop.xlane.xlu0 %1165 }
 0x2dc   : > { %vm1153_vm9 = vcmp.eq.f32.partialorder %v4427_v26, %v3858_v13  ;;  %vm1167_vm10 = vcmp.eq.f32.partialorder %v4428_v16, %v3860_v42  ;;  %v809_v24 = vshll.u32 %v808_v10, 16  ;;  %v850_v16 = vcvt.f32.s32 %v3748_v53 }
 0x2dd   : > { %v1154_v25 = vsel %vm1153_vm9, %v1149_v9, inf  ;;  %v1168_v18 = vsel %vm1167_vm10, %v1163_v0, inf  ;;  %v822_v9 = vcvt.f32.s32 %v3738_v12  ;;  %v4437_v12 = vld [vmem:[#allocation20_spill] sm:$0xff]  ;;  %v934_v10 = vcvt.f32.s32 %v3778_v50 }
 0x2de   : > { %1155 = vmin.xlane.f32.xlu1 %v1154_v25  ;;  %1169 = vmin.xlane.f32.xlu0 %v1168_v18  ;;  %v864_v25 = vcvt.f32.s32 %v3750_v63  ;;  %v851_v63 = vshll.u32 %v850_v16, 16  ;;  %v962_v16 = vcvt.f32.s32 %v3788_v4 }
 0x2df   : > { %v3869_v56 = vpop.xlane.xlu1 %1179  ;;  %v3871_v27 = vpop.xlane.xlu0 %1193  ;;  %v823_v26 = vshll.u32 %v822_v9, 16  ;;  %v948_v9 = vcvt.f32.s32 %v3780_v49  ;;  %v935_v49 = vshll.u32 %v934_v10, 16 }
 0x2e0   : > { %vm1181_vm11 = vcmp.eq.f32.partialorder %v4431_v14, %v3869_v56  ;;  %vm1195_vm12 = vcmp.eq.f32.partialorder %v4432_v34, %v3871_v27  ;;  %v865_v30 = vshll.u32 %v864_v25, 16  ;;  %v892_v14 = vcvt.f32.s32 %v3760_v20 }
 0x2e1   : > { %v1182_v15 = vsel %vm1181_vm11, %v1177_v58, inf  ;;  %v1196_v32 = vsel %vm1195_vm12, %v1191_v43, inf  ;;  %v879_v20 = vshll.u32 %v878_v39, 16  ;;  %v976_v25 = vcvt.f32.s32 %v3790_v54 }
 0x2e2   : > { %1183 = vmin.xlane.f32.xlu1 %v1182_v15  ;;  %1197 = vmin.xlane.f32.xlu0 %v1196_v32  ;;  %v963_v54 = vshll.u32 %v962_v16, 16  ;;  %v1116_v16 = vcvt.f32.s32 %v3840_v60 }
 0x2e3   : > { %v3879_v33 = vpop.xlane.xlu1 %1207  ;;  %v3881_v45 = vpop.xlane.xlu0 %1221 }
 0x2e4   : > { %vm1209_vm13 = vcmp.eq.f32.partialorder %v4434_v36, %v3879_v33  ;;  %vm1223_vm14 = vcmp.eq.f32.partialorder %v4435_v7, %v3881_v45  ;;  %v920_v36 = vcvt.f32.s32 %v3770_v1 }
 0x2e5   : > { %v1210_v57 = vsel %vm1209_vm13, %v1205_v47, inf  ;;  %v1224_v48 = vsel %vm1223_vm14, %v1219_v3, inf  ;;  %v893_v47 = vshll.u32 %v892_v14, 16  ;;  %v906_v3 = vcvt.f32.s32 %v3768_v38 }
 0x2e6   : > { %1211 = vmin.xlane.f32.xlu1 %v1210_v57  ;;  %1225 = vmin.xlane.f32.xlu0 %v1224_v48 }
 0x2e7   : > { %v3887_v22 = vpop.xlane.xlu1 %1235  ;;  %v907_v1 = vshll.u32 %v906_v3, 16 }
 0x2e8   : > { %vm1237_vm15 = vcmp.eq.f32.partialorder %v4436_v52, %v3887_v22 }
 0x2e9   : > { %v1238_v6 = vsel %vm1237_vm15, %v1233_v62, inf }
 0x2ea   : > { %1239 = vmin.xlane.f32.xlu1 %v1238_v6  ;;  %v921_v6 = vshll.u32 %v920_v36, 16 }
 0x337   : > { %v806_v0 = vpop.xlane.xlu0 %805 }
 0x338   : > { %v807_v29 = vcvt.f32.s32 %v806_v0 }
 0x33a   : > { %v810_v21 = vadd.s32 %v809_v24, %v807_v29 }
 0x33b   : > { %v820_v18 = vpop.xlane.xlu1 %819  ;;  %v834_v11 = vpop.xlane.xlu0 %833 }
 0x33c   : > { %v821_v58 = vcvt.f32.s32 %v820_v18  ;;  %v835_v59 = vcvt.f32.s32 %v834_v11  ;;  %1246 = vst.msk [vmem:[%s3897_s27] sm:$0xff] %vm1245_vm0, %v810_v21  ;;  %vm1278_vm1 = vcmp.eq.s32.totalorder %v4437_v12, %v810_v21 }
 0x33d   : > { %2543 = vmatprep.mubr.msk.f32.mxu1 %vm1278_vm1, %v3041_v41 }
 0x33e   : > { %v824_v53 = vadd.s32 %v823_v26, %v821_v58  ;;  %v838_v43 = vadd.s32 %v837_v28, %v835_v59  ;;  %v949_v26 = vshll.u32 %v948_v9, 16  ;;  %v1074_v9 = vcvt.f32.s32 %v3828_v35 }
 0x33f   : > { %v848_v34 = vpop.xlane.xlu1 %847  ;;  %v862_v15 = vpop.xlane.xlu0 %861 }
 0x340   : > { %1247 = vst.msk [vmem:[%s3897_s27 + $0x8] sm:$0xff] %vm1245_vm0, %v824_v53  ;;  %1248 = vst.msk [vmem:[%s3897_s27 + $0x10] sm:$0xff] %vm1245_vm0, %v838_v43  ;;  %v849_v32 = vcvt.f32.s32 %v848_v34  ;;  %v863_v61 = vcvt.f32.s32 %v862_v15  ;;  %vm1279_vm2 = vcmp.eq.s32.totalorder %v4437_v12, %v824_v53  ;;  %vm1280_vm3 = vcmp.eq.s32.totalorder %v4437_v12, %v838_v43 }
 0x341   : > { %2544 = vmatmul.mubr.msk.f32.vlgmr.msra.gmra.mrb[0].mxu1 %vm1279_vm2, %v3041_v41  ;;  %v977_v53 = vshll.u32 %v976_v25, 16  ;;  %v990_v43 = vcvt.f32.s32 %v3798_v8 }
 0x342   : > { %v852_v46 = vadd.s32 %v851_v63, %v849_v32  ;;  %v866_v40 = vadd.s32 %v865_v30, %v863_v61  ;;  %2546 = vmatprep.mubr.msk.f32.mxu1 %vm1280_vm3, %v3041_v41  ;;  %v1004_v63 = vcvt.f32.s32 %v3800_v5  ;;  %v1018_v61 = vcvt.f32.s32 %v3808_v19 }
 0x343   : > { %v876_v7 = vpop.xlane.xlu1 %875  ;;  %v890_v57 = vpop.xlane.xlu0 %889  ;;  %v991_v5 = vshll.u32 %v990_v43, 16 }
 0x344   : > { %1249 = vst.msk [vmem:[%s3897_s27 + $0x18] sm:$0xff] %vm1245_vm0, %v852_v46  ;;  %1250 = vst.msk [vmem:[%s3897_s27 + $0x20] sm:$0xff] %vm1245_vm0, %v866_v40  ;;  %v877_v48 = vcvt.f32.s32 %v876_v7  ;;  %v891_v62 = vcvt.f32.s32 %v890_v57  ;;  %vm1281_vm4 = vcmp.eq.s32.totalorder %v4437_v12, %v852_v46  ;;  %vm1282_vm5 = vcmp.eq.s32.totalorder %v4437_v12, %v866_v40 }
 0x345   : > { %2547 = vmatmul.mubr.msk.f32.gmra.mrb[2].mxu1 %vm1281_vm4, %v3041_v41  ;;  %v1005_v32 = vshll.u32 %v1004_v63, 16  ;;  %v1032_v46 = vcvt.f32.s32 %v3810_v23  ;;  %v1019_v23 = vshll.u32 %v1018_v61, 16  ;;  %v1046_v57 = vcvt.f32.s32 %v3818_v44 }
 0x346   : > { %v880_v52 = vadd.s32 %v879_v20, %v877_v48  ;;  %v894_v38 = vadd.s32 %v893_v47, %v891_v62  ;;  %2549 = vmatprep.mubr.msk.f32.mxu1 %vm1282_vm5, %v3041_v41  ;;  %v1060_v48 = vcvt.f32.s32 %v3820_v17 }
 0x347   : > { %v904_v0 = vpop.xlane.xlu1 %903  ;;  %v918_v24 = vpop.xlane.xlu0 %917  ;;  %v1033_v7 = vshll.u32 %v1032_v46, 16  ;;  %v1047_v17 = vshll.u32 %v1046_v57, 16 }
 0x348   : > { %1251 = vst.msk [vmem:[%s3897_s27 + $0x28] sm:$0xff] %vm1245_vm0, %v880_v52  ;;  %1252 = vst.msk [vmem:[%s3897_s27 + $0x30] sm:$0xff] %vm1245_vm0, %v894_v38  ;;  %v905_v2 = vcvt.f32.s32 %v904_v0  ;;  %v919_v29 = vcvt.f32.s32 %v918_v24  ;;  %vm1283_vm6 = vcmp.eq.s32.totalorder %v4437_v12, %v880_v52  ;;  %vm1284_vm7 = vcmp.eq.s32.totalorder %v4437_v12, %v894_v38 }
 0x349   : > { %2550 = vmatmul.mubr.msk.f32.gmra.mrb[4].mxu1 %vm1283_vm6, %v3041_v41  ;;  %v1061_v10 = vshll.u32 %v1060_v48, 16  ;;  %v1088_v0 = vcvt.f32.s32 %v3830_v37  ;;  %v1075_v37 = vshll.u32 %v1074_v9, 16  ;;  %v1214_v48 = vcvt.f32.s32 %v3879_v33 }
 0x34a   : > { %v908_v21 = vadd.s32 %v907_v1, %v905_v2  ;;  %v922_v50 = vadd.s32 %v921_v6, %v919_v29  ;;  %2552 = vmatprep.mubr.msk.f32.mxu1 %vm1284_vm7, %v3041_v41 }
 0x34b   : > { %v932_v18 = vpop.xlane.xlu1 %931  ;;  %v946_v11 = vpop.xlane.xlu0 %945 }
 0x34c   : > { %1253 = vst.msk [vmem:[%s3897_s27 + $0x38] sm:$0xff] %vm1245_vm0, %v908_v21  ;;  %1254 = vst.msk [vmem:[%s3897_s27 + $0x40] sm:$0xff] %vm1245_vm0, %v922_v50  ;;  %v933_v28 = vcvt.f32.s32 %v932_v18  ;;  %v947_v58 = vcvt.f32.s32 %v946_v11  ;;  %vm1285_vm8 = vcmp.eq.s32.totalorder %v4437_v12, %v908_v21  ;;  %vm1286_vm9 = vcmp.eq.s32.totalorder %v4437_v12, %v922_v50 }
 0x34d   : > { %2553 = vmatmul.mubr.msk.f32.gmra.mrb[6].mxu1 %vm1285_vm8, %v3041_v41 }
 0x34e   : > { %v936_v59 = vadd.s32 %v935_v49, %v933_v28  ;;  %v950_v4 = vadd.s32 %v949_v26, %v947_v58  ;;  %2555 = vmatprep.mubr.msk.f32.mxu1 %vm1286_vm9, %v3041_v41  ;;  %v1089_v49 = vshll.u32 %v1088_v0, 16  ;;  %v1102_v26 = vcvt.f32.s32 %v3838_v31 }
 0x34f   : > { %v960_v30 = vpop.xlane.xlu1 %959  ;;  %v974_v39 = vpop.xlane.xlu0 %973 }
 0x350   : > { %1255 = vst.msk [vmem:[%s3897_s27 + $0x48] sm:$0xff] %vm1245_vm0, %v936_v59  ;;  %1256 = vst.msk [vmem:[%s3897_s27 + $0x50] sm:$0xff] %vm1245_vm0, %v950_v4  ;;  %v961_v14 = vcvt.f32.s32 %v960_v30  ;;  %v975_v34 = vcvt.f32.s32 %v974_v39  ;;  %vm1287_vm10 = vcmp.eq.s32.totalorder %v4437_v12, %v936_v59  ;;  %vm1288_vm11 = vcmp.eq.s32.totalorder %v4437_v12, %v950_v4 }
 0x351   : > { %2556 = vmatmul.mubr.msk.f32.gmra.mrb[8].mxu1 %vm1287_vm10, %v3041_v41  ;;  %v1103_v60 = vshll.u32 %v1102_v26, 16  ;;  %v1117_v59 = vshll.u32 %v1116_v16, 16  ;;  %v1130_v4 = vcvt.f32.s32 %v3848_v55 }
 0x352   : > { %v964_v15 = vadd.s32 %v963_v54, %v961_v14  ;;  %v978_v8 = vadd.s32 %v977_v53, %v975_v34  ;;  %2558 = vmatprep.mubr.msk.f32.mxu1 %vm1288_vm11, %v3041_v41  ;;  %v1144_v54 = vcvt.f32.s32 %v3850_v51  ;;  %v1158_v34 = vcvt.f32.s32 %v3858_v13 }
 0x353   : > { %v988_v40 = vpop.xlane.xlu1 %987  ;;  %v1002_v20 = vpop.xlane.xlu0 %1001  ;;  %v1131_v51 = vshll.u32 %v1130_v4, 16 }
 0x354   : > { %1257 = vst.msk [vmem:[%s3897_s27 + $0x58] sm:$0xff] %vm1245_vm0, %v964_v15  ;;  %1258 = vst.msk [vmem:[%s3897_s27 + $0x60] sm:$0xff] %vm1245_vm0, %v978_v8  ;;  %v989_v47 = vcvt.f32.s32 %v988_v40  ;;  %v1003_v3 = vcvt.f32.s32 %v1002_v20  ;;  %vm1289_vm12 = vcmp.eq.s32.totalorder %v4437_v12, %v964_v15  ;;  %vm1290_vm13 = vcmp.eq.s32.totalorder %v4437_v12, %v978_v8 }
 0x355   : > { %2559 = vmatmul.mubr.msk.f32.gmra.mrb[10].mxu1 %vm1289_vm12, %v3041_v41  ;;  %v1145_v14 = vshll.u32 %v1144_v54, 16  ;;  %v1172_v15 = vcvt.f32.s32 %v3860_v42  ;;  %v1159_v42 = vshll.u32 %v1158_v34, 16  ;;  %v1186_v20 = vcvt.f32.s32 %v3869_v56  ;;  %v2752_v34 = vld [vmem:[%s3296_s10] sm:$0xff] }
 0x356   : > { %v992_v36 = vadd.s32 %v991_v5, %v989_v47  ;;  %v1006_v19 = vadd.s32 %v1005_v32, %v1003_v3  ;;  %2561 = vmatprep.mubr.msk.f32.mxu1 %vm1290_vm13, %v3041_v41  ;;  %v1200_v47 = vcvt.f32.s32 %v3871_v27 }
 0x357   : > { %v1016_v62 = vpop.xlane.xlu1 %1015  ;;  %v1030_v52 = vpop.xlane.xlu0 %1029  ;;  %v1173_v40 = vshll.u32 %v1172_v15, 16  ;;  %v1187_v27 = vshll.u32 %v1186_v20, 16 }
 0x358   : > { %1259 = vst.msk [vmem:[%s3897_s27 + $0x68] sm:$0xff] %vm1245_vm0, %v992_v36  ;;  %1260 = vst.msk [vmem:[%s3897_s27 + $0x70] sm:$0xff] %vm1245_vm0, %v1006_v19  ;;  %v1017_v38 = vcvt.f32.s32 %v1016_v62  ;;  %v1031_v1 = vcvt.f32.s32 %v1030_v52  ;;  %vm1291_vm14 = vcmp.eq.s32.totalorder %v4437_v12, %v992_v36  ;;  %vm1292_vm15 = vcmp.eq.s32.totalorder %v4437_v12, %v1006_v19 }
 0x359   : > { %2562 = vmatmul.mubr.msk.f32.gmra.mrb[12].mxu1 %vm1291_vm14, %v3041_v41  ;;  %v1201_v57 = vshll.u32 %v1200_v47, 16  ;;  %v1228_v62 = vcvt.f32.s32 %v3881_v45  ;;  %v1215_v45 = vshll.u32 %v1214_v48, 16 }
 0x35a   : > { %v1020_v6 = vadd.s32 %v1019_v23, %v1017_v38  ;;  %v1034_v44 = vadd.s32 %v1033_v7, %v1031_v1  ;;  %2564 = vmatprep.mubr.msk.f32.mxu1 %vm1292_vm15, %v3041_v41 }
 0x35b   : > { %v1044_v24 = vpop.xlane.xlu1 %1043  ;;  %v1058_v2 = vpop.xlane.xlu0 %1057 }
 0x35c   : > { %1261 = vst.msk [vmem:[%s3897_s27 + $0x78] sm:$0xff] %vm1245_vm0, %v1020_v6  ;;  %1262 = vst.msk [vmem:[%s3897_s27 + $0x80] sm:$0xff] %vm1245_vm0, %v1034_v44  ;;  %v1045_v29 = vcvt.f32.s32 %v1044_v24  ;;  %v1059_v21 = vcvt.f32.s32 %v1058_v2  ;;  %vm1293_vm1 = vcmp.eq.s32.totalorder %v4437_v12, %v1020_v6  ;;  %vm1294_vm2 = vcmp.eq.s32.totalorder %v4437_v12, %v1034_v44 }
 0x35d   : > { %2565 = vmatmul.mubr.msk.f32.gmra.mrb[14].mxu1 %vm1293_vm1, %v3041_v41 }
 0x35e   : > { %v1048_v50 = vadd.s32 %v1047_v17, %v1045_v29  ;;  %v1062_v35 = vadd.s32 %v1061_v10, %v1059_v21  ;;  %2567 = vmatprep.mubr.msk.f32.mxu1 %vm1294_vm2, %v3041_v41  ;;  %v1229_v17 = vshll.u32 %v1228_v62, 16  ;;  %v1242_v10 = vcvt.f32.s32 %v3887_v22 }
 0x35f   : > { %v1072_v25 = vpop.xlane.xlu1 %1071  ;;  %v1086_v18 = vpop.xlane.xlu0 %1085 }
 0x360   : > { %1263 = vst.msk [vmem:[%s3897_s27 + $0x88] sm:$0xff] %vm1245_vm0, %v1048_v50  ;;  %1264 = vst.msk [vmem:[%s3897_s27 + $0x90] sm:$0xff] %vm1245_vm0, %v1062_v35  ;;  %v1073_v11 = vcvt.f32.s32 %v1072_v25  ;;  %v1087_v28 = vcvt.f32.s32 %v1086_v18  ;;  %vm1295_vm3 = vcmp.eq.s32.totalorder %v4437_v12, %v1048_v50  ;;  %vm1296_vm4 = vcmp.eq.s32.totalorder %v4437_v12, %v1062_v35 }
 0x361   : > { %2568 = vmatmul.mubr.msk.f32.gmra.mrb[16].mxu1 %vm1295_vm3, %v3041_v41  ;;  %v1243_v50 = vshll.u32 %v1242_v10, 16  ;;  %v4059_v25 = vstv %s2288_s29 }
 0x362   : > { %v1076_v58 = vadd.s32 %v1075_v37, %v1073_v11  ;;  %v1090_v31 = vadd.s32 %v1089_v49, %v1087_v28  ;;  %2570 = vmatprep.mubr.msk.f32.mxu1 %vm1296_vm4, %v3041_v41  ;;  %v4438_v49 = vlaneseq }
 0x363   : > { %v1100_v53 = vpop.xlane.xlu1 %1099  ;;  %v1114_v43 = vpop.xlane.xlu0 %1113 }
 0x364   : > { %1265 = vst.msk [vmem:[%s3897_s27 + $0x98] sm:$0xff] %vm1245_vm0, %v1076_v58  ;;  %1266 = vst.msk [vmem:[%s3897_s27 + $0xa0] sm:$0xff] %vm1245_vm0, %v1090_v31  ;;  %v1101_v63 = vcvt.f32.s32 %v1100_v53  ;;  %v1115_v30 = vcvt.f32.s32 %v1114_v43  ;;  %vm1297_vm5 = vcmp.eq.s32.totalorder %v4437_v12, %v1076_v58  ;;  %vm1298_vm6 = vcmp.eq.s32.totalorder %v4437_v12, %v1090_v31 }
 0x365   : > { %2571 = vmatmul.mubr.msk.f32.gmra.mrb[18].mxu1 %vm1297_vm5, %v3041_v41  ;;  %v4055_v26 = vshrl.u32 %v4438_v49, 7  ;;  %v2757_v49 = vld [vmem:[%s3296_s10 + $0x38] sm:$0xff] }
 0x366   : > { %v1104_v39 = vadd.s32 %v1103_v60, %v1101_v63  ;;  %v1118_v55 = vadd.s32 %v1117_v59, %v1115_v30  ;;  %2573 = vmatprep.mubr.msk.f32.mxu1 %vm1298_vm6, %v3041_v41  ;;  %v3042_v59 = vmov 0.0   ;;  %v2751_v63 = vld [vmem:[%s3296_s10 + $0x8] sm:$0xff] }
 0x367   : > { %v1128_v8 = vpop.xlane.xlu1 %1127  ;;  %v1142_v5 = vpop.xlane.xlu0 %1141  ;;  %v1650_v16 = vadd.s32 8, %v4055_v26  ;;  %v1652_v11 = vadd.s32 24, %v4055_v26  ;;  %v1651_v28 = vadd.s32 16, %v4055_v26  ;;  %v1654_v31 = vadd.s32 40, %v4055_v26 }
 0x368   : > { %1267 = vst.msk [vmem:[%s3897_s27 + $0xa8] sm:$0xff] %vm1245_vm0, %v1104_v39  ;;  %1268 = vst.msk [vmem:[%s3897_s27 + $0xb0] sm:$0xff] %vm1245_vm0, %v1118_v55  ;;  %v1129_v32 = vcvt.f32.s32 %v1128_v8  ;;  %v1143_v61 = vcvt.f32.s32 %v1142_v5  ;;  %vm1299_vm7 = vcmp.eq.s32.totalorder %v4437_v12, %v1104_v39  ;;  %vm1300_vm8 = vcmp.eq.s32.totalorder %v4437_v12, %v1118_v55 }
 0x369   : > { %2574 = vmatmul.mubr.msk.f32.gmra.mrb[20].mxu1 %vm1299_vm7, %v3041_v41  ;;  %v1683_v18 = vadd.s32 %v4059_v25, %v1650_v16  ;;  %v1684_v58 = vadd.s32 %v4059_v25, %v1651_v28  ;;  %v1653_v60 = vadd.s32 32, %v4055_v26  ;;  %v1687_v53 = vadd.s32 %v4059_v25, %v1654_v31 }
 0x36a   : > { %v1132_v46 = vadd.s32 %v1131_v51, %v1129_v32  ;;  %v1146_v13 = vadd.s32 %v1145_v14, %v1143_v61  ;;  %2576 = vmatprep.mubr.msk.f32.mxu1 %vm1300_vm8, %v3041_v41  ;;  %v1656_v51 = vadd.s32 56, %v4055_v26  ;;  %v1655_v14 = vadd.s32 48, %v4055_v26 }
 0x36b   : > { %v1156_v3 = vpop.xlane.xlu1 %1155  ;;  %v1170_v36 = vpop.xlane.xlu0 %1169  ;;  %vm1716_vm5 = vcmp.lt.s32.totalorder %v1684_v58, 512  ;;  %v1686_v43 = vadd.s32 %v4059_v25, %v1653_v60  ;;  %vm1719_vm6 = vcmp.lt.s32.totalorder %v1687_v53, 512 }
 0x36c   : > { %1269 = vst.msk [vmem:[%s3897_s27 + $0xb8] sm:$0xff] %vm1245_vm0, %v1132_v46  ;;  %1270 = vst.msk [vmem:[%s3897_s27 + $0xc0] sm:$0xff] %vm1245_vm0, %v1146_v13  ;;  %v1157_v19 = vcvt.f32.s32 %v1156_v3  ;;  %v1171_v23 = vcvt.f32.s32 %v1170_v36  ;;  %vm1301_vm9 = vcmp.eq.s32.totalorder %v4437_v12, %v1132_v46  ;;  %vm1302_vm10 = vcmp.eq.s32.totalorder %v4437_v12, %v1146_v13 }
 0x36d   : > { %2577 = vmatmul.mubr.msk.f32.gmra.mrb[22].mxu1 %vm1301_vm9, %v3041_v41  ;;  %v2291_v5 = vsel %vm1716_vm5, 1.0, %v3042_v59  ;;  %vm1718_vm7 = vcmp.lt.s32.totalorder %v1686_v43, 512  ;;  %v1658_v13 = vadd.s32 72, %v4055_v26  ;;  %v1689_v3 = vadd.s32 %v4059_v25, %v1656_v51 }
 0x36e   : > { %v1160_v7 = vadd.s32 %v1159_v42, %v1157_v19  ;;  %v1174_v56 = vadd.s32 %v1173_v40, %v1171_v23  ;;  %2579 = vmatprep.mubr.msk.f32.mxu1 %vm1302_vm10, %v3041_v41  ;;  %v2753_v42 = vld [vmem:[%s3296_s10 + $0x18] sm:$0xff]  ;;  %v1688_v36 = vadd.s32 %v4059_v25, %v1655_v14  ;;  %v2754_v19 = vld [vmem:[%s3296_s10 + $0x10] sm:$0xff] }
 0x36f   : > { %v1184_v52 = vpop.xlane.xlu1 %1183  ;;  %v1198_v38 = vpop.xlane.xlu0 %1197  ;;  %vm1721_vm8 = vcmp.lt.s32.totalorder %v1689_v3, 512  ;;  %v2761_v3 = vld [vmem:[%s3296_s10 + $0x58] sm:$0xff] }
 0x370   : > { %1271 = vst.msk [vmem:[%s3897_s27 + $0xc8] sm:$0xff] %vm1245_vm0, %v1160_v7  ;;  %1272 = vst.msk [vmem:[%s3897_s27 + $0xd0] sm:$0xff] %vm1245_vm0, %v1174_v56  ;;  %v1185_v1 = vcvt.f32.s32 %v1184_v52  ;;  %v1199_v6 = vcvt.f32.s32 %v1198_v38  ;;  %vm1303_vm11 = vcmp.eq.s32.totalorder %v4437_v12, %v1160_v7  ;;  %vm1304_vm12 = vcmp.eq.s32.totalorder %v4437_v12, %v1174_v56 }
 0x371   : > { %2580 = vmatmul.mubr.msk.f32.gmra.mrb[24].mxu1 %vm1303_vm11, %v3041_v41  ;;  %v1657_v56 = vadd.s32 64, %v4055_v26  ;;  %v2293_v52 = vsel %vm1718_vm7, 1.0, %v3042_v59  ;;  %v1691_v38 = vadd.s32 %v4059_v25, %v1658_v13  ;;  %vm1720_vm9 = vcmp.lt.s32.totalorder %v1688_v36, 512 }
 0x372   : > { %v1188_v44 = vadd.s32 %v1187_v27, %v1185_v1  ;;  %v1202_v33 = vadd.s32 %v1201_v57, %v1199_v6  ;;  %2582 = vmatprep.mubr.msk.f32.mxu1 %vm1304_vm12, %v3041_v41  ;;  %v2294_v57 = vsel %vm1719_vm6, 1.0, %v3042_v59  ;;  %v1660_v1 = vadd.s32 88, %v4055_v26  ;;  %v2755_v6 = vld [vmem:[%s3296_s10 + $0x28] sm:$0xff] }
 0x373   : > { %v1212_v9 = vpop.xlane.xlu1 %1211  ;;  %v1226_v0 = vpop.xlane.xlu0 %1225  ;;  %vm1723_vm10 = vcmp.lt.s32.totalorder %v1691_v38, 512 }
 0x374   : > { %1273 = vst.msk [vmem:[%s3897_s27 + $0xd8] sm:$0xff] %vm1245_vm0, %v1188_v44  ;;  %1274 = vst.msk [vmem:[%s3897_s27 + $0xe0] sm:$0xff] %vm1245_vm0, %v1202_v33  ;;  %v1213_v24 = vcvt.f32.s32 %v1212_v9  ;;  %v1227_v2 = vcvt.f32.s32 %v1226_v0  ;;  %vm1305_vm13 = vcmp.eq.s32.totalorder %v4437_v12, %v1188_v44  ;;  %vm1306_vm14 = vcmp.eq.s32.totalorder %v4437_v12, %v1202_v33 }
 0x375   : > { %2583 = vmatmul.mubr.msk.f32.gmra.mrb[26].mxu1 %vm1305_vm13, %v3041_v41  ;;  %v1690_v0 = vadd.s32 %v4059_v25, %v1657_v56  ;;  %v1665_v56 = vadd.s32 128, %v4055_v26 }
 0x376   : > { %v1216_v29 = vadd.s32 %v1215_v45, %v1213_v24  ;;  %v1230_v21 = vadd.s32 %v1229_v17, %v1227_v2  ;;  %2585 = vmatprep.mubr.msk.f32.mxu1 %vm1306_vm14, %v3041_v41  ;;  %v2756_v17 = vld [vmem:[%s3296_s10 + $0x20] sm:$0xff]  ;;  %v1659_v24 = vadd.s32 80, %v4055_v26 }
 0x377   : > { %v1240_v22 = vpop.xlane.xlu1 %1239  ;;  %vm1722_vm11 = vcmp.lt.s32.totalorder %v1690_v0, 512  ;;  %v1668_v0 = vadd.s32 152, %v4055_v26 }
 0x378   : > { %1275 = vst.msk [vmem:[%s3897_s27 + $0xe8] sm:$0xff] %vm1245_vm0, %v1216_v29  ;;  %1276 = vst.msk [vmem:[%s3897_s27 + $0xf0] sm:$0xff] %vm1245_vm0, %v1230_v21  ;;  %v1241_v35 = vcvt.f32.s32 %v1240_v22  ;;  %vm1307_vm15 = vcmp.eq.s32.totalorder %v4437_v12, %v1216_v29  ;;  %vm1308_vm1 = vcmp.eq.s32.totalorder %v4437_v12, %v1230_v21  ;;  %v1662_v29 = vadd.s32 104, %v4055_v26 }
 0x379   : > { %2586 = vmatmul.mubr.msk.f32.gmra.mrb[28].mxu1 %vm1307_vm15, %v3041_v41  ;;  %v1661_v21 = vadd.s32 96, %v4055_v26  ;;  %v1692_v31 = vadd.s32 %v4059_v25, %v1659_v24  ;;  %v2764_v24 = vld [vmem:[%s3296_s10 + $0x60] sm:$0xff] }
 0x37a   : > { %v1244_v37 = vadd.s32 %v1243_v50, %v1241_v35  ;;  %2588 = vmatprep.mubr.msk.f32.mxu1 %vm1308_vm1, %v3041_v41  ;;  %v2296_v35 = vsel %vm1721_vm8, 1.0, %v3042_v59 }
 0x37b   : > { %v1694_v53 = vadd.s32 %v4059_v25, %v1661_v21  ;;  %vm1724_vm13 = vcmp.lt.s32.totalorder %v1692_v31, 512  ;;  %v1667_v21 = vadd.s32 144, %v4055_v26 }
 0x37c   : > { %1277 = vst.msk [vmem:[%s3897_s27 + $0xf8] sm:$0xff] %vm1245_vm0, %v1244_v37  ;;  %vm1309_vm2 = vcmp.eq.s32.totalorder %v4437_v12, %v1244_v37  ;;  %v1682_v12 = vadd.s32 %v4059_v25, %v4055_v26  ;;  %vm1715_vm0 = vcmp.lt.s32.totalorder %v1683_v18, 512  ;;  %v1693_v37 = vadd.s32 %v4059_v25, %v1660_v1 }
 0x37d   : > { %2589 = vmatmul.mubr.msk.f32.gmra.mrb[30].mxu1 %vm1309_vm2, %v3041_v41  ;;  %v1685_v41 = vadd.s32 %v4059_v25, %v1652_v11  ;;  %v2290_v4 = vsel %vm1715_vm0, 1.0, %v3042_v59  ;;  %v2295_v11 = vsel %vm1720_vm9, 1.0, %v3042_v59  ;;  %vm1726_vm15 = vcmp.lt.s32.totalorder %v1694_v53, 512 }
 0x37e   : > { %vm1714_vm3 = vcmp.lt.s32.totalorder %v1682_v12, 512  ;;  %v2758_v12 = vld [vmem:[%s3296_s10 + $0x30] sm:$0xff]  ;;  %vm1725_vm12 = vcmp.lt.s32.totalorder %v1693_v37, 512  ;;  %v2301_v38 = vsel %vm1726_vm15, 1.0, %v3042_v59 }
 0x37f   : > { %vm1717_vm4 = vcmp.lt.s32.totalorder %v1685_v41, 512  ;;  %v2289_v55 = vsel %vm1714_vm3, 1.0, %v3042_v59 }
 0x380   : > { %v2292_v8 = vsel %vm1717_vm4, 1.0, %v3042_v59 }
 0x414   : > { %v2545_v54 = vpop.f32.mrb[0].mxu1 }
 0x415   : > { %1616 = vst [vmem:[%s4074_s9 + $0x8] sm:$0xff] %v2545_v54  ;;  %v1811_v30 = vsub.f32 %v2545_v54, %v2751_v63  ;;  %v1456_v39 = vpop.f32.mrb[1].mxu1  ;;  %v1695_v54 = vadd.s32 %v4059_v25, %v1662_v29 }
 0x416   : > { %1615 = vst [vmem:[%s4074_s9] sm:$0xff] %v1456_v39  ;;  %v1810_v15 = vsub.f32 %v1456_v39, %v2752_v34  ;;  %v1663_v39 = vadd.s32 112, %v4055_v26  ;;  %v2297_v34 = vsel %vm1722_vm11, 1.0, %v3042_v59 }
 0x417   : > { %v1843_v32 = vmul.f32 %v2290_v4, %v1811_v30  ;;  %v2298_v4 = vsel %vm1723_vm10, 1.0, %v3042_v59  ;;  %v1664_v30 = vadd.s32 120, %v4055_v26  ;;  %vm1727_vm14 = vcmp.lt.s32.totalorder %v1695_v54, 512 }
 0x418   : > { %v2548_v61 = vpop.f32.mrb[2].mxu1  ;;  %v1842_v46 = vmul.f32 %v2289_v55, %v1810_v15  ;;  %v2759_v55 = vld [vmem:[%s3296_s10 + $0x48] sm:$0xff]  ;;  %v1669_v54 = vadd.s32 160, %v4055_v26 }
 0x419   : > { %1618 = vst [vmem:[%s4074_s9 + $0x18] sm:$0xff] %v2548_v61  ;;  %v1813_v40 = vsub.f32 %v2548_v61, %v2753_v42  ;;  %v1466_v20 = vpop.f32.mrb[3].mxu1  ;;  %v1875_v47 = vmul.f32 %v1843_v32, %v1843_v32 }
 0x41a   : > { %1617 = vst [vmem:[%s4074_s9 + $0x10] sm:$0xff] %v1466_v20  ;;  %v1812_v23 = vsub.f32 %v1466_v20, %v2754_v19  ;;  %v1874_v7 = vmul.f32 %v1842_v46, %v1842_v46  ;;  %v2300_v46 = vsel %vm1725_vm12, 1.0, %v3042_v59  ;;  %v1696_v20 = vadd.s32 %v4059_v25, %v1663_v39 }
 0x41b   : > { %v1845_v27 = vmul.f32 %v2292_v8, %v1813_v40  ;;  %1908 = vadd.xlane.f32.xlu1 %v1875_v47  ;;  %v2760_v8 = vld [vmem:[%s3296_s10 + $0x40] sm:$0xff]  ;;  %v1697_v40 = vadd.s32 %v4059_v25, %v1664_v30  ;;  %v1666_v47 = vadd.s32 136, %v4055_v26 }
 0x41c   : > { %v1844_v48 = vmul.f32 %v2291_v5, %v1812_v23  ;;  %1906 = vadd.xlane.f32.xlu0 %v1874_v7  ;;  %v2551_v62 = vpop.f32.mrb[4].mxu1  ;;  %v2299_v23 = vsel %vm1724_vm13, 1.0, %v3042_v59  ;;  %vm1728_vm2 = vcmp.lt.s32.totalorder %v1696_v20, 512 }
 0x41d   : > { %1620 = vst [vmem:[%s4074_s9 + $0x28] sm:$0xff] %v2551_v62  ;;  %v1815_v44 = vsub.f32 %v2551_v62, %v2755_v6  ;;  %v1476_v33 = vpop.f32.mrb[5].mxu1  ;;  %v1877_v45 = vmul.f32 %v1845_v27, %v1845_v27  ;;  %v2762_v27 = vld [vmem:[%s3296_s10 + $0x50] sm:$0xff]  ;;  %vm1729_vm1 = vcmp.lt.s32.totalorder %v1697_v40, 512 }
 0x41e   : > { %1619 = vst [vmem:[%s4074_s9 + $0x20] sm:$0xff] %v1476_v33  ;;  %v1814_v10 = vsub.f32 %v1476_v33, %v2756_v17  ;;  %v1876_v9 = vmul.f32 %v1844_v48, %v1844_v48  ;;  %v2763_v33 = vld [vmem:[%s3296_s10 + $0x68] sm:$0xff] }
 0x41f   : > { %v1847_v2 = vmul.f32 %v2294_v57, %v1815_v44  ;;  %1912 = vadd.xlane.f32.xlu1 %v1877_v45  ;;  %v1699_v44 = vadd.s32 %v4059_v25, %v1666_v47 }
 0x420   : > { %v1846_v22 = vmul.f32 %v2293_v52, %v1814_v10  ;;  %1910 = vadd.xlane.f32.xlu0 %v1876_v9  ;;  %v2554_v50 = vpop.f32.mrb[6].mxu1  ;;  %v2302_v52 = vsel %vm1727_vm14, 1.0, %v3042_v59  ;;  %v1698_v9 = vadd.s32 %v4059_v25, %v1665_v56 }
 0x421   : > { %1622 = vst [vmem:[%s4074_s9 + $0x38] sm:$0xff] %v2554_v50  ;;  %v1817_v16 = vsub.f32 %v2554_v50, %v2757_v49  ;;  %v1486_v18 = vpop.f32.mrb[7].mxu1  ;;  %v1879_v28 = vmul.f32 %v1847_v2, %v1847_v2  ;;  %v2304_v50 = vsel %vm1729_vm1, 1.0, %v3042_v59  ;;  %v2303_v49 = vsel %vm1728_vm2, 1.0, %v3042_v59 }
 0x422   : > { %1621 = vst [vmem:[%s4074_s9 + $0x30] sm:$0xff] %v1486_v18  ;;  %v1816_v41 = vsub.f32 %v1486_v18, %v2758_v12  ;;  %v1878_v58 = vmul.f32 %v1846_v22, %v1846_v22  ;;  %vm1731_vm0 = vcmp.lt.s32.totalorder %v1699_v44, 512  ;;  %v2765_v18 = vld [vmem:[%s3296_s10 + $0x78] sm:$0xff]  ;;  %vm1730_vm3 = vcmp.lt.s32.totalorder %v1698_v9, 512  ;;  %v2771_v9 = vld [vmem:[%s3296_s10 + $0xa8] sm:$0xff] }
 0x423   : > { %v1849_v60 = vmul.f32 %v2296_v35, %v1817_v16  ;;  %1916 = vadd.xlane.f32.xlu1 %v1879_v28  ;;  %v1670_v16 = vadd.s32 168, %v4055_v26 }
 0x424   : > { %v1848_v43 = vmul.f32 %v2295_v11, %v1816_v41  ;;  %1914 = vadd.xlane.f32.xlu0 %v1878_v58  ;;  %v2557_v63 = vpop.f32.mrb[8].mxu1  ;;  %v1701_v41 = vadd.s32 %v4059_v25, %v1668_v0  ;;  %v2766_v58 = vld [vmem:[%s3296_s10 + $0x70] sm:$0xff] }
 0x425   : > { %1624 = vst [vmem:[%s4074_s9 + $0x48] sm:$0xff] %v2557_v63  ;;  %v1819_v51 = vsub.f32 %v2557_v63, %v2759_v55  ;;  %v1496_v14 = vpop.f32.mrb[9].mxu1  ;;  %v1881_v15 = vmul.f32 %v1849_v60, %v1849_v60  ;;  %v1671_v63 = vadd.s32 176, %v4055_v26  ;;  %v2306_v55 = vsel %vm1731_vm0, 1.0, %v3042_v59 }
 0x426   : > { %1623 = vst [vmem:[%s4074_s9 + $0x40] sm:$0xff] %v1496_v14  ;;  %v1818_v5 = vsub.f32 %v1496_v14, %v2760_v8  ;;  %v1880_v32 = vmul.f32 %v1848_v43, %v1848_v43  ;;  %v1672_v43 = vadd.s32 184, %v4055_v26  ;;  %v2767_v14 = vld [vmem:[%s3296_s10 + $0x88] sm:$0xff]  ;;  %v2305_v8 = vsel %vm1730_vm3, 1.0, %v3042_v59 }
 0x427   : > { %v1851_v61 = vmul.f32 %v2298_v4, %v1819_v51  ;;  %1920 = vadd.xlane.f32.xlu1 %v1881_v15  ;;  %v1700_v4 = vadd.s32 %v4059_v25, %v1667_v21  ;;  %v1703_v51 = vadd.s32 %v4059_v25, %v1670_v16  ;;  %vm1733_vm4 = vcmp.lt.s32.totalorder %v1701_v41, 512  ;;  %v2773_v41 = vld [vmem:[%s3296_s10 + $0xb8] sm:$0xff] }
 0x428   : > { %v1850_v13 = vmul.f32 %v2297_v34, %v1818_v5  ;;  %1918 = vadd.xlane.f32.xlu0 %v1880_v32  ;;  %v2560_v42 = vpop.f32.mrb[10].mxu1  ;;  %v2768_v32 = vld [vmem:[%s3296_s10 + $0x80] sm:$0xff]  ;;  %v1705_v40 = vadd.s32 %v4059_v25, %v1672_v43  ;;  %v1704_v20 = vadd.s32 %v4059_v25, %v1671_v63  ;;  %v1677_v63 = vadd.s32 224, %v4055_v26 }
 0x429   : > { %1626 = vst [vmem:[%s4074_s9 + $0x58] sm:$0xff] %v2560_v42  ;;  %v1821_v36 = vsub.f32 %v2560_v42, %v2761_v3  ;;  %v1506_v19 = vpop.f32.mrb[11].mxu1  ;;  %v1883_v7 = vmul.f32 %v1851_v61, %v1851_v61  ;;  %vm1732_vm5 = vcmp.lt.s32.totalorder %v1700_v4, 512  ;;  %vm1735_vm6 = vcmp.lt.s32.totalorder %v1703_v51, 512 }
 0x42a   : > { %1625 = vst [vmem:[%s4074_s9 + $0x50] sm:$0xff] %v1506_v19  ;;  %v1820_v57 = vsub.f32 %v1506_v19, %v2762_v27  ;;  %v1882_v48 = vmul.f32 %v1850_v13, %v1850_v13  ;;  %v1702_v13 = vadd.s32 %v4059_v25, %v1669_v54  ;;  %v1674_v19 = vadd.s32 200, %v4055_v26  ;;  %v2774_v54 = vld [vmem:[%s3296_s10 + $0xb0] sm:$0xff] }
 0x42b   : > { %v1853_v62 = vmul.f32 %v2300_v46, %v1821_v36  ;;  %1924 = vadd.xlane.f32.xlu1 %v1883_v7  ;;  %v2308_v36 = vsel %vm1733_vm4, 1.0, %v3042_v59  ;;  %v2307_v27 = vsel %vm1732_vm5, 1.0, %v3042_v59  ;;  %vm1737_vm8 = vcmp.lt.s32.totalorder %v1705_v40, 512 }
 0x42c   : > { %v1852_v1 = vmul.f32 %v2299_v23, %v1820_v57  ;;  %1922 = vadd.xlane.f32.xlu0 %v1882_v48  ;;  %v2563_v6 = vpop.f32.mrb[12].mxu1  ;;  %v2769_v23 = vld [vmem:[%s3296_s10 + $0x98] sm:$0xff]  ;;  %v1673_v48 = vadd.s32 192, %v4055_v26  ;;  %vm1734_vm7 = vcmp.lt.s32.totalorder %v1702_v13, 512  ;;  %vm1736_vm9 = vcmp.lt.s32.totalorder %v1704_v20, 512 }
 0x42d   : > { %1628 = vst [vmem:[%s4074_s9 + $0x68] sm:$0xff] %v2563_v6  ;;  %v1823_v45 = vsub.f32 %v2563_v6, %v2763_v33  ;;  %v1516_v17 = vpop.f32.mrb[13].mxu1  ;;  %v1885_v10 = vmul.f32 %v1853_v62, %v1853_v62  ;;  %v2770_v62 = vld [vmem:[%s3296_s10 + $0x90] sm:$0xff]  ;;  %v2310_v6 = vsel %vm1735_vm6, 1.0, %v3042_v59  ;;  %v2311_v16 = vsel %vm1736_vm9, 1.0, %v3042_v59 }
 0x42e   : > { %1627 = vst [vmem:[%s4074_s9 + $0x60] sm:$0xff] %v1516_v17  ;;  %v1822_v2 = vsub.f32 %v1516_v17, %v2764_v24  ;;  %v1884_v29 = vmul.f32 %v1852_v1, %v1852_v1  ;;  %v1676_v17 = vadd.s32 216, %v4055_v26  ;;  %v1706_v21 = vadd.s32 %v4059_v25, %v1673_v48  ;;  %v2778_v48 = vld [vmem:[%s3296_s10 + $0xd0] sm:$0xff] }
 0x42f   : > { %v1855_v22 = vmul.f32 %v2302_v52, %v1823_v45  ;;  %1928 = vadd.xlane.f32.xlu1 %v1885_v10  ;;  %v1707_v45 = vadd.s32 %v4059_v25, %v1674_v19  ;;  %v1675_v10 = vadd.s32 208, %v4055_v26  ;;  %v1678_v4 = vadd.s32 232, %v4055_v26 }
 0x430   : > { %v1854_v35 = vmul.f32 %v2301_v38, %v1822_v2  ;;  %1926 = vadd.xlane.f32.xlu0 %v1884_v29  ;;  %v2566_v37 = vpop.f32.mrb[14].mxu1  ;;  %v2309_v2 = vsel %vm1734_vm7, 1.0, %v3042_v59  ;;  %vm1738_vm11 = vcmp.lt.s32.totalorder %v1706_v21, 512  ;;  %v1710_v40 = vadd.s32 %v4059_v25, %v1677_v63 }
 0x431   : > { %1630 = vst [vmem:[%s4074_s9 + $0x78] sm:$0xff] %v2566_v37  ;;  %v1825_v11 = vsub.f32 %v2566_v37, %v2765_v18  ;;  %v1526_v28 = vpop.f32.mrb[15].mxu1  ;;  %v1887_v12 = vmul.f32 %v1855_v22, %v1855_v22  ;;  %v2772_v22 = vld [vmem:[%s3296_s10 + $0xa0] sm:$0xff]  ;;  %vm1739_vm10 = vcmp.lt.s32.totalorder %v1707_v45, 512  ;;  %v1679_v20 = vadd.s32 240, %v4055_v26  ;;  %v2779_v45 = vld [vmem:[%s3296_s10 + $0xe8] sm:$0xff] }
 0x432   : > { %1629 = vst [vmem:[%s4074_s9 + $0x70] sm:$0xff] %v1526_v28  ;;  %v1824_v31 = vsub.f32 %v1526_v28, %v2766_v58  ;;  %v1886_v60 = vmul.f32 %v1854_v35, %v1854_v35  ;;  %v1709_v28 = vadd.s32 %v4059_v25, %v1676_v17  ;;  %vm1742_vm15 = vcmp.lt.s32.totalorder %v1710_v40, 512 }
 0x433   : > { %v1857_v53 = vmul.f32 %v2304_v50, %v1825_v11  ;;  %1932 = vadd.xlane.f32.xlu1 %v1887_v12  ;;  %v1708_v12 = vadd.s32 %v4059_v25, %v1675_v10  ;;  %vm2011_vm0 = vcmask (!%p4439_p8), 0  }
 0x434   : > { %v1856_v30 = vmul.f32 %v2303_v49, %v1824_v31  ;;  %1930 = vadd.xlane.f32.xlu0 %v1886_v60  ;;  %v2569_v39 = vpop.f32.mrb[16].mxu1  ;;  %v2312_v49 = vsel %vm1737_vm8, 1.0, %v3042_v59  ;;  %vm1741_vm12 = vcmp.lt.s32.totalorder %v1709_v28, 512 }
 0x435   : > { %1632 = vst [vmem:[%s4074_s9 + $0x88] sm:$0xff] %v2569_v39  ;;  %v1827_v34 = vsub.f32 %v2569_v39, %v2767_v14  ;;  %v1536_v15 = vpop.f32.mrb[17].mxu1  ;;  %v1889_v5 = vmul.f32 %v1857_v53, %v1857_v53  ;;  %v2314_v39 = vsel %vm1739_vm10, 1.0, %v3042_v59  ;;  %v2313_v14 = vsel %vm1738_vm11, 1.0, %v3042_v59 }
 0x436   : > { %1631 = vst [vmem:[%s4074_s9 + $0x80] sm:$0xff] %v1536_v15  ;;  %v1826_v61 = vsub.f32 %v1536_v15, %v2768_v32  ;;  %v1888_v46 = vmul.f32 %v1856_v30, %v1856_v30  ;;  %vm1740_vm13 = vcmp.lt.s32.totalorder %v1708_v12, 512  ;;  %v1711_v32 = vadd.s32 %v4059_v25, %v1678_v4 }
 0x437   : > { %v1859_v42 = vmul.f32 %v2306_v55, %v1827_v34  ;;  %1936 = vadd.xlane.f32.xlu1 %v1889_v5  ;;  %v2775_v34 = vld [vmem:[%s3296_s10 + $0xc8] sm:$0xff]  ;;  %v2316_v19 = vsel %vm1741_vm12, 1.0, %v3042_v59 }
 0x438   : > { %v1858_v47 = vmul.f32 %v2305_v8, %v1826_v61  ;;  %1934 = vadd.xlane.f32.xlu0 %v1888_v46  ;;  %v2572_v3 = vpop.f32.mrb[18].mxu1  ;;  %v1680_v61 = vadd.s32 248, %v4055_v26  ;;  %v2776_v46 = vld [vmem:[%s3296_s10 + $0xc0] sm:$0xff]  ;;  %vm1743_vm14 = vcmp.lt.s32.totalorder %v1711_v32, 512 }
 0x439   : > { %1634 = vst [vmem:[%s4074_s9 + $0x98] sm:$0xff] %v2572_v3  ;;  %v1829_v7 = vsub.f32 %v2572_v3, %v2769_v23  ;;  %v1546_v56 = vpop.f32.mrb[19].mxu1  ;;  %v1891_v57 = vmul.f32 %v1859_v42, %v1859_v42  ;;  %v2315_v23 = vsel %vm1740_vm13, 1.0, %v3042_v59 }
 0x43a   : > { %1633 = vst [vmem:[%s4074_s9 + $0x90] sm:$0xff] %v1546_v56  ;;  %v1828_v52 = vsub.f32 %v1546_v56, %v2770_v62  ;;  %v1890_v38 = vmul.f32 %v1858_v47, %v1858_v47  ;;  %v1713_v26 = vadd.s32 %v4059_v25, %v1680_v61 }
 0x43b   : > { %v1861_v1 = vmul.f32 %v2308_v36, %v1829_v7  ;;  %1940 = vadd.xlane.f32.xlu1 %v1891_v57  ;;  %v2777_v7 = vld [vmem:[%s3296_s10 + $0xd8] sm:$0xff] }
 0x43c   : > { %v1860_v44 = vmul.f32 %v2307_v27, %v1828_v52  ;;  %1938 = vadd.xlane.f32.xlu0 %v1890_v38  ;;  %v2575_v33 = vpop.f32.mrb[20].mxu1  ;;  %v1712_v38 = vadd.s32 %v4059_v25, %v1679_v20  ;;  %vm1745_vm1 = vcmp.lt.s32.totalorder %v1713_v26, 512 }
 0x43d   : > { %1636 = vst [vmem:[%s4074_s9 + $0xa8] sm:$0xff] %v2575_v33  ;;  %v1831_v0 = vsub.f32 %v2575_v33, %v2771_v9  ;;  %v1556_v24 = vpop.f32.mrb[21].mxu1  ;;  %v1893_v29 = vmul.f32 %v1861_v1, %v1861_v1  ;;  %v2318_v33 = vsel %vm1743_vm14, 1.0, %v3042_v59  ;;  %v2317_v9 = vsel %vm1742_vm15, 1.0, %v3042_v59 }
 0x43e   : > { %1635 = vst [vmem:[%s4074_s9 + $0xa0] sm:$0xff] %v1556_v24  ;;  %v1830_v50 = vsub.f32 %v1556_v24, %v2772_v22  ;;  %v1892_v35 = vmul.f32 %v1860_v44, %v1860_v44  ;;  %v2780_v24 = vld [vmem:[%s3296_s10 + $0xe0] sm:$0xff]  ;;  %vm1744_vm2 = vcmp.lt.s32.totalorder %v1712_v38, 512 }
 0x43f   : > { %v1863_v37 = vmul.f32 %v2310_v6, %v1831_v0  ;;  %1944 = vadd.xlane.f32.xlu1 %v1893_v29 }
 0x440   : > { %v1862_v18 = vmul.f32 %v2309_v2, %v1830_v50  ;;  %1942 = vadd.xlane.f32.xlu0 %v1892_v35  ;;  %v2578_v11 = vpop.f32.mrb[22].mxu1  ;;  %v2320_v50 = vsel %vm1745_vm1, 1.0, %v3042_v59  ;;  %v2781_v35 = vld [vmem:[%s3296_s10 + $0xf8] sm:$0xff] }
 0x441   : > { %1638 = vst [vmem:[%s4074_s9 + $0xb8] sm:$0xff] %v2578_v11  ;;  %v1833_v58 = vsub.f32 %v2578_v11, %v2773_v41  ;;  %v1566_v31 = vpop.f32.mrb[23].mxu1  ;;  %v1895_v60 = vmul.f32 %v1863_v37, %v1863_v37  ;;  %v2782_v11 = vld [vmem:[%s3296_s10 + $0xf0] sm:$0xff] }
 0x442   : > { %1637 = vst [vmem:[%s4074_s9 + $0xb0] sm:$0xff] %v1566_v31  ;;  %v1832_v53 = vsub.f32 %v1566_v31, %v2774_v54  ;;  %v1894_v43 = vmul.f32 %v1862_v18, %v1862_v18 }
 0x443   : > { %v1865_v30 = vmul.f32 %v2312_v49, %v1833_v58  ;;  %1948 = vadd.xlane.f32.xlu1 %v1895_v60 }
 0x444   : > { %v1864_v55 = vmul.f32 %v2311_v16, %v1832_v53  ;;  %1946 = vadd.xlane.f32.xlu0 %v1894_v43  ;;  %v2581_v51 = vpop.f32.mrb[24].mxu1  ;;  %v2319_v16 = vsel %vm1744_vm2, 1.0, %v3042_v59 }
 0x445   : > { %1640 = vst [vmem:[%s4074_s9 + $0xc8] sm:$0xff] %v2581_v51  ;;  %v1835_v15 = vsub.f32 %v2581_v51, %v2775_v34  ;;  %v1576_v8 = vpop.f32.mrb[25].mxu1  ;;  %v1897_v5 = vmul.f32 %v1865_v30, %v1865_v30 }
 0x446   : > { %1639 = vst [vmem:[%s4074_s9 + $0xc0] sm:$0xff] %v1576_v8  ;;  %v1834_v13 = vsub.f32 %v1576_v8, %v2776_v46  ;;  %v1896_v42 = vmul.f32 %v1864_v55, %v1864_v55 }
 0x447   : > { %v1867_v47 = vmul.f32 %v2314_v39, %v1835_v15  ;;  %1952 = vadd.xlane.f32.xlu1 %v1897_v5 }
 0x448   : > { %v1866_v3 = vmul.f32 %v2313_v14, %v1834_v13  ;;  %1950 = vadd.xlane.f32.xlu0 %v1896_v42  ;;  %v2584_v36 = vpop.f32.mrb[26].mxu1 }
 0x449   : > { %1642 = vst [vmem:[%s4074_s9 + $0xd8] sm:$0xff] %v2584_v36  ;;  %v1837_v56 = vsub.f32 %v2584_v36, %v2777_v7  ;;  %v1586_v27 = vpop.f32.mrb[27].mxu1  ;;  %v1899_v57 = vmul.f32 %v1867_v47, %v1867_v47 }
 0x44a   : > { %1641 = vst [vmem:[%s4074_s9 + $0xd0] sm:$0xff] %v1586_v27  ;;  %v1836_v62 = vsub.f32 %v1586_v27, %v2778_v48  ;;  %v1898_v52 = vmul.f32 %v1866_v3, %v1866_v3 }
 0x44b   : > { %v1869_v1 = vmul.f32 %v2316_v19, %v1837_v56  ;;  %1956 = vadd.xlane.f32.xlu1 %v1899_v57 }
 0x44c   : > { %v1868_v6 = vmul.f32 %v2315_v23, %v1836_v62  ;;  %1954 = vadd.xlane.f32.xlu0 %v1898_v52  ;;  %v2587_v44 = vpop.f32.mrb[28].mxu1 }
 0x44d   : > { %1644 = vst [vmem:[%s4074_s9 + $0xe8] sm:$0xff] %v2587_v44  ;;  %v1839_v17 = vsub.f32 %v2587_v44, %v2779_v45  ;;  %v1596_v10 = vpop.f32.mrb[29].mxu1  ;;  %v1901_v0 = vmul.f32 %v1869_v1, %v1869_v1 }
 0x44e   : > { %1643 = vst [vmem:[%s4074_s9 + $0xe0] sm:$0xff] %v1596_v10  ;;  %v1838_v25 = vsub.f32 %v1596_v10, %v2780_v24  ;;  %v1900_v2 = vmul.f32 %v1868_v6, %v1868_v6 }
 0x44f   : > { %v1871_v29 = vmul.f32 %v2318_v33, %v1839_v17  ;;  %1960 = vadd.xlane.f32.xlu1 %v1901_v0 }
 0x450   : > { %v1870_v21 = vmul.f32 %v2317_v9, %v1838_v25  ;;  %1958 = vadd.xlane.f32.xlu0 %v1900_v2  ;;  %v2590_v22 = vpop.f32.mrb[30].mxu1 }
 0x451   : > { %1646 = vst [vmem:[%s4074_s9 + $0xf8] sm:$0xff] %v2590_v22  ;;  %v1841_v37 = vsub.f32 %v2590_v22, %v2781_v35  ;;  %v1606_v49 = vpop.f32.mrb[31].mxu1  ;;  %v1903_v18 = vmul.f32 %v1871_v29, %v1871_v29 }
 0x452   : > { %1645 = vst [vmem:[%s4074_s9 + $0xf0] sm:$0xff] %v1606_v49  ;;  %v1840_v28 = vsub.f32 %v1606_v49, %v2782_v11  ;;  %v1902_v12 = vmul.f32 %v1870_v21, %v1870_v21 }
 0x453   : > { %v1873_v41 = vmul.f32 %v2320_v50, %v1841_v37  ;;  %1964 = vadd.xlane.f32.xlu1 %v1903_v18 }
 0x454   : > { %v1872_v58 = vmul.f32 %v2319_v16, %v1840_v28  ;;  %1962 = vadd.xlane.f32.xlu0 %v1902_v12 }
 0x455   : > { %v1905_v31 = vmul.f32 %v1873_v41, %v1873_v41 }
 0x456   : > { %v1904_v60 = vmul.f32 %v1872_v58, %v1872_v58 }
 0x457   : > { %1968 = vadd.xlane.f32.xlu1 %v1905_v31 }
 0x458   : > { %1966 = vadd.xlane.f32.xlu0 %v1904_v60 }
 0x4a8   : > { %v1909_v4 = vpop.xlane.xlu1 %1908 }
 0x4a9   : > { %v1907_v54 = vpop.xlane.xlu0 %1906 }
 0x4aa   : > { %v1970_v53 = vadd.f32 %v1909_v4, %v1907_v54 }
 0x4ac   : > { %v1913_v43 = vpop.xlane.xlu1 %1912 }
 0x4ad   : > { %v1911_v63 = vpop.xlane.xlu0 %1910 }
 0x4ae   : > { %v1971_v30 = vadd.f32 %v1970_v53, %v1911_v63 }
 0x4b0   : > { %v1917_v59 = vpop.xlane.xlu1 %1916  ;;  %v1972_v39 = vadd.f32 %v1971_v30, %v1913_v43  ;;  %v3043_v30 = vmov (!%p4439_p8), 0.0  }
 0x4b1   : > { %v1915_v55 = vpop.xlane.xlu0 %1914  ;;  %2012 = vst.msk [vmem:[#allocation13] sm:$0x1] (!%p4439_p8), %vm2011_vm0, %v3043_v30 }
 0x4b2   : > { %v1973_v51 = vadd.f32 %v1972_v39, %v1915_v55 }
 0x4b4   : > { %v1921_v14 = vpop.xlane.xlu1 %1920  ;;  %v1974_v34 = vadd.f32 %v1973_v51, %v1917_v59 }
 0x4b5   : > { %v1919_v15 = vpop.xlane.xlu0 %1918 }
 0x4b6   : > { %v1975_v8 = vadd.f32 %v1974_v34, %v1919_v15 }
 0x4b8   : > { %v1925_v5 = vpop.xlane.xlu1 %1924  ;;  %v1976_v32 = vadd.f32 %v1975_v8, %v1921_v14 }
 0x4b9   : > { %v1923_v61 = vpop.xlane.xlu0 %1922 }
 0x4ba   : > { %v1977_v46 = vadd.f32 %v1976_v32, %v1923_v61 }
 0x4bc   : > { %v1929_v13 = vpop.xlane.xlu1 %1928  ;;  %v1978_v42 = vadd.f32 %v1977_v46, %v1925_v5 }
 0x4bd   : > { %v1927_v40 = vpop.xlane.xlu0 %1926 }
 0x4be   : > { %v1979_v20 = vadd.f32 %v1978_v42, %v1927_v40 }
 0x4c0   : > { %v1933_v47 = vpop.xlane.xlu1 %1932  ;;  %v1980_v3 = vadd.f32 %v1979_v20, %v1929_v13 }
 0x4c1   : > { %v1931_v36 = vpop.xlane.xlu0 %1930 }
 0x4c2   : > { %v1981_v19 = vadd.f32 %v1980_v3, %v1931_v36 }
 0x4c4   : > { %v1937_v23 = vpop.xlane.xlu1 %1936  ;;  %v1982_v7 = vadd.f32 %v1981_v19, %v1933_v47 }
 0x4c5   : > { %v1935_v56 = vpop.xlane.xlu0 %1934 }
 0x4c6   : > { %v1983_v27 = vadd.f32 %v1982_v7, %v1935_v56 }
 0x4c8   : > { %v1941_v57 = vpop.xlane.xlu1 %1940  ;;  %v1984_v26 = vadd.f32 %v1983_v27, %v1937_v23 }
 0x4c9   : > { %v1939_v48 = vpop.xlane.xlu0 %1938 }
 0x4ca   : > { %v1985_v62 = vadd.f32 %v1984_v26, %v1939_v48 }
 0x4cc   : > { %v1945_v52 = vpop.xlane.xlu1 %1944  ;;  %v1986_v38 = vadd.f32 %v1985_v62, %v1941_v57 }
 0x4cd   : > { %v1943_v1 = vpop.xlane.xlu0 %1942 }
 0x4ce   : > { %v1987_v6 = vadd.f32 %v1986_v38, %v1943_v1 }
 0x4d0   : > { %v1949_v44 = vpop.xlane.xlu1 %1948  ;;  %v1988_v33 = vadd.f32 %v1987_v6, %v1945_v52 }
 0x4d1   : > { %v1947_v45 = vpop.xlane.xlu0 %1946 }
 0x4d2   : > { %v1989_v17 = vadd.f32 %v1988_v33, %v1947_v45 }
 0x4d4   : > { %v1953_v10 = vpop.xlane.xlu1 %1952  ;;  %v1990_v9 = vadd.f32 %v1989_v17, %v1949_v44 }
 0x4d5   : > { %v1951_v0 = vpop.xlane.xlu0 %1950 }
 0x4d6   : > { %v1991_v24 = vadd.f32 %v1990_v9, %v1951_v0 }
 0x4d8   : > { %v1957_v25 = vpop.xlane.xlu1 %1956  ;;  %v1992_v2 = vadd.f32 %v1991_v24, %v1953_v10 }
 0x4d9   : > { %v1955_v29 = vpop.xlane.xlu0 %1954 }
 0x4da   : > { %v1993_v21 = vadd.f32 %v1992_v2, %v1955_v29 }
 0x4dc   : > { %v1961_v22 = vpop.xlane.xlu1 %1960  ;;  %v1994_v50 = vadd.f32 %v1993_v21, %v1957_v25 }
 0x4dd   : > { %v1959_v35 = vpop.xlane.xlu0 %1958 }
 0x4de   : > { %v1995_v37 = vadd.f32 %v1994_v50, %v1959_v35 }
 0x4e0   : > { %v1996_v49 = vadd.f32 %v1995_v37, %v1961_v22  ;;  %v1965_v16 = vpop.xlane.xlu1 %1964 }
 0x4e1   : > { %v1963_v18 = vpop.xlane.xlu0 %1962 }
 0x4e2   : > { %v1997_v11 = vadd.f32 %v1996_v49, %v1963_v18 }
 0x4e4   : > { %v1998_v28 = vadd.f32 %v1997_v11, %v1965_v16  ;;  %v1969_v58 = vpop.xlane.xlu1 %1968 }
 0x4e5   : > { %v1967_v12 = vpop.xlane.xlu0 %1966 }
 0x4e6   : > { %v1999_v41 = vadd.f32 %v1998_v28, %v1967_v12 }
 0x4e8   : > { %v2000_v31 = vadd.f32 %v1999_v41, %v1969_v58 }
 0x4ea   : > { %v2001_v60 = vrot.slane %v2000_v31, 4 }
 0x4ec   : > { %v2002_v4 = vadd.f32 %v2001_v60, %v2000_v31 }
 0x4ee   : > { %v2003_v54 = vrot.slane %v2002_v4, 2  ;;  %2010 = sbr.rel (%p4439_p8) target bundleno = 1269 (0x4f5), region = 56 }
 0x4f0   : > { %v2004_v53 = vadd.f32 %v2003_v54, %v2002_v4 }
 0x4f2   : > { %v2005_v43 = vrot.slane %v2004_v53, 1 }
 0x4f4   : > { %v2006_v63 = vadd.f32 %v2005_v43, %v2004_v53 }
 0x4f5 PF: > { %v2013_v59 = vld [vmem:[#allocation13] sm:$0x1]  ;;  %vm2015_vm3 = vcmask 0   ;;  %s2022_s11 = sand.u32 1, %s3105_s25   ;;  %s2333_s7 = sshll.u32 %s3105_s25, 12 }
 0x4f6   : > { %v2014_v39 = vadd.f32 %v2013_v59, %v2006_v63  ;;  %s4251_s17 = scalar_lea.hbm %s4365_s5, %s2333_s7  ;;  %s2052_s19 = sshll.u32 %s3897_s27, 4  ;;  %s4254_s19 = int_to_ptr.vmem [resolvable:$true] %s2052_s19 }
 0x4f7   : > { %s4259_s20 = scalar_lea.hbm %s4364_s4, %s2333_s7  ;;  %s4261_s13 = scalar_lea.sflag [#allocation12], %s2022_s11 }
 0x4f8   : > { %2016 = vst.msk [vmem:[#allocation13] sm:$0x1] %vm2015_vm3, %v2014_v39  ;;  %s2897_s10 = scalar_lea.vmem %s4254_s19, 4096  ;;  %s3044_s29 = smov [#allocation11]  }
 0x4f9   : > { %p2898_p11 = scmp.ne.s32.totalorder %s4254_s19, %s2897_s10  ;;  %s2901_s26 = sshll.u32 %s3044_s29, 4  ;;  %s2902_s26 = int_to_ptr.vmem [resolvable:$false] %s2901_s26 }
 0x4fa   : > { %s2903_s27 = scalar_lea.vmem %s2902_s26, 8192  ;;  %p2904_p1 = scmp.lt.s32.totalorder %s4254_s19, %s2902_s26 }
 0x4fb   : > { %p2899_p7 = pnand %p2898_p11, %p3238_p5  ;;  %p2905_p2 = scmp.lt.s32.totalorder %s2903_s27, %s2897_s10 }
 0x4fd   : > { %p2900_p13 = pneg %p2899_p7  ;;  %p2906_p4 = por %p2905_p2, %p2904_p1 }
 0x4ff   : > { %p2907_p10 = pnand %p2906_p4, %p2900_p13 }
 0x501   : > { %2910 = shalt.err (!%p2907_p10)
}
 0x502   : > { %s2911_s11 = scalar_lea.hbm %s4251_s17, 4096  ;;  %s2915_s12 = scalar_lea.hbm %s4365_s5, 8192 }
 0x503   : > { %p2912_p3 = scmp.ne.s32.totalorder %s4251_s17, %s2911_s11  ;;  %p2916_p0 = scmp.lt.u32.totalorder %s4251_s17, %s4365_s5 }
 0x504   : > { %p2917_p6 = scmp.lt.u32.totalorder %s2915_s12, %s2911_s11  ;;  %p2919_p11 = scmp.lt.u32.totalorder %s2911_s11, %s4251_s17 }
 0x505   : > { %p2913_p12 = pnand %p2912_p3, %p3238_p5 }
 0x506   : > { %p2918_p8 = por %p2917_p6, %p2916_p0 }
 0x507   : > { %p2914_p9 = pneg %p2913_p12 }
 0x508   : > { %p2920_p7 = por %p2919_p11, %p2918_p8 }
 0x50a   : > { %p2921_p13 = pnand %p2920_p7, %p2914_p9 }
 0x50c   : > { %2924 = shalt.err (!%p2921_p13)
}
 0x50d   : > { %s3045_s10 = smov 128   ;;  %s3046_s26 = smov 8  }
 0x50e   : > { %2670 = dma.vmem_to_hbm [thread:$0]  (%p3238_p5), %s4254_s19, 4096, %s4251_s17, %s4261_s13, %s3045_s10, %s3045_s10, %s3046_s26  }
 0x50f   : > { %s2036_s27 = sshll.u32 %s4074_s9, 4  ;;  %s2018_s11 = scalar_lea.sflag [#allocation4], %s3289_s8  ;;  %s4289_s27 = int_to_ptr.vmem [resolvable:$true] %s2036_s27 }
 0x510   : > { %s2925_s7 = scalar_lea.vmem %s4289_s27, 4096  ;;  %s3047_s14 = smov [#allocation10]  }
 0x511   : > { %p2926_p1 = scmp.ne.s32.totalorder %s4289_s27, %s2925_s7  ;;  %s2929_s12 = sshll.u32 %s3047_s14, 4  ;;  %s2930_s12 = int_to_ptr.vmem [resolvable:$false] %s2929_s12 }
 0x512   : > { %s2931_s30 = scalar_lea.vmem %s2930_s12, 8192  ;;  %p2932_p10 = scmp.lt.s32.totalorder %s4289_s27, %s2930_s12 }
 0x513   : > { %p2927_p2 = pnand %p2926_p1, %p3238_p5  ;;  %p2933_p3 = scmp.lt.s32.totalorder %s2931_s30, %s2925_s7 }
 0x515   : > { %p2928_p4 = pneg %p2927_p2  ;;  %p2934_p12 = por %p2933_p3, %p2932_p10 }
 0x517   : > { %p2935_p9 = pnand %p2934_p12, %p2928_p4 }
 0x519   : > { %2938 = shalt.err (!%p2935_p9)
}
 0x51a   : > { %s2939_s9 = scalar_lea.hbm %s4259_s20, 4096  ;;  %s2943_s13 = scalar_lea.hbm %s4364_s4, 8192 }
 0x51b   : > { %p2940_p0 = scmp.ne.s32.totalorder %s4259_s20, %s2939_s9  ;;  %p2944_p11 = scmp.lt.u32.totalorder %s4259_s20, %s4364_s4 }
 0x51c   : > { %p2945_p7 = scmp.lt.u32.totalorder %s2943_s13, %s2939_s9  ;;  %p2947_p1 = scmp.lt.u32.totalorder %s2939_s9, %s4259_s20 }
 0x51d   : > { %p2941_p6 = pnand %p2940_p0, %p3238_p5 }
 0x51e   : > { %p2946_p13 = por %p2945_p7, %p2944_p11 }
 0x51f   : > { %p2942_p8 = pneg %p2941_p6 }
 0x520   : > { %p2948_p2 = por %p2947_p1, %p2946_p13 }
 0x522   : > { %p2949_p4 = pnand %p2948_p2, %p2942_p8 }
 0x524   : > { %2952 = shalt.err (!%p2949_p4)
}
 0x525   : > { %2669 = dma.vmem_to_hbm [thread:$0]  (%p3238_p5), %s4289_s27, 4096, %s4259_s20, %s2018_s11, %s3045_s10, %s3045_s10, %s3046_s26  }
 0x526   : > { %s3048_s7 = smov [#allocation13]   ;;  %p4440_p3 = scmp.eq.s32.totalorder %s3105_s25, 1 }
 0x527   : > { %s2066_s12 = sshll.u32 %s3048_s7, 4  ;;  %s2067_s12 = int_to_ptr.vmem [resolvable:$true] %s2066_s12 }
 0x528   : > { %s2953_s30 = scalar_lea.vmem %s2067_s12, 16  ;;  %s2959_s9 = scalar_lea.vmem %s2067_s12, 32 }
 0x529   : > { %p2954_p10 = scmp.ne.s32.totalorder %s2067_s12, %s2953_s30  ;;  %p2960_p0 = scmp.lt.s32.totalorder %s2067_s12, %s2067_s12 }
 0x52a   : > { %p2961_p6 = scmp.lt.s32.totalorder %s2959_s9, %s2953_s30 }
 0x52b   : > { %p2955_p12 = pnand %p2954_p10, %p4440_p3 }
 0x52c   : > { %p2962_p8 = por %p2961_p6, %p2960_p0 }
 0x52d   : > { %p2956_p9 = pneg %p2955_p12 }
 0x52f   : > { %p2963_p11 = pnand %p2962_p8, %p2956_p9 }
 0x531   : > { %2966 = shalt.err (!%p2963_p11)
}
 0x532   : > { %s2967_s17 = scalar_lea.hbm %s4366_s6, 16  ;;  %p4441_p7 = pmov %p4440_p3 }
 0x533   : > { %p2968_p5 = scmp.ne.s32.totalorder %s4366_s6, %s2967_s17  ;;  %p2973_p2 = scmp.lt.u32.totalorder %s2967_s17, %s4366_s6 }
 0x535   : > { %p2969_p13 = pnand %p2968_p5, %p4441_p7 }
 0x537   : > { %p2970_p1 = pneg %p2969_p13 }
 0x539   : > { %p2975_p4 = pnand %p2973_p2, %p2970_p1 }
 0x53b   : > { %2978 = shalt.err (!%p2975_p4)
}
 0x53c   : > { %p4442_p10 = pmov %p4440_p3 }
 0x53e   : > { %2672 = dma.vmem_to_hbm [thread:$0]  (%p4442_p10), %s2067_s12, 16, %s4366_s6, [#allocation12]  }
 0x53f   : > { %3008 = dma.done.wait (%p4440_p3), [#allocation12], 16   ;;  %p4443_p12 = pmov %p4440_p3 }
 0x541   : > { %3010 = vsyncadd (%p4443_p12), [#allocation12], 4294967280 }
 0x542 PF: > { %s2082_s13 = sand.u32 1, %s3021_s21   ;;  %p4444_p9 = scmp.ne.s32.totalorder %s4391_s28, 0 }
 0x543   : > { %p4445_p0 = scmp.ge.s32.totalorder %s3033_s24, 2  ;;  %s2083_s29 = scalar_lea.sflag [#allocation4], %s2082_s13 }
 0x545   : > { %p2692_p6 = pnand %p4445_p0, %p4444_p9 }
 0x547   : > { %3012 = dma.done.wait (!%p2692_p6), %s2083_s29, 4096  }
 0x548   : > { %3014 = vsyncadd (!%p2692_p6), %s2083_s29, 4294963200  ;;  %s4446_s14 = sadd.s32 4294967294, %s3033_s24  }
 0x549   : > { %s2091_s7 = sand.u32 1, %s4446_s14  }
 0x54a   : > { %s2092_s12 = scalar_lea.sflag [#allocation12], %s2091_s7 }
 0x54b   : > { %3016 = dma.done.wait (!%p2692_p6), %s2092_s12, 4096  }
 0x54c   : > { %3018 = vsyncadd (!%p2692_p6), %s2092_s12, 4294963200  ;;  %p25_p8 = scmp.ge.s32.totalorder %s3224_s18, 4   ;;  %s4447_s21 = smov %s3025_s22 }
 0x54d   : > { %s4448_s22 = smov %s3029_s23  ;;  %s4449_s23 = smov %s3234_s15 }
 0x54e   : > { %s4450_s24 = smov %s3224_s18  ;;  %27 = sbr.rel (!%p25_p8) target bundleno = 9 (0x9), region = 122 }
 0x555   :  { %2097 = vsyncpa [#allocation3], 1 }
 0x556   :  { %2099 = vsyncpa [#allocation3 + $0x1], 1 }
 0x557   :  { %2100 = vsyncpa [#allocation6], 1 }
 0x558   :  { %2101 = vsyncpa [#allocation9], 1 }
 0x559   :  { %2102 = vsyncpa [#allocation4], 1 }
 0x55a   :  { %2104 = vsyncpa [#allocation4 + $0x1], 1 }
 0x55b   :  { %2105 = vsyncpa [#allocation12], 1 }
 0x55c   :  { %2107 = vsyncpa [#allocation12 + $0x1], 1 }

</bundles_post_ra>
